<compile_context>
chip_gen: v5e
topology: v5e:2x2
jax: 0.10.0
libtpu: 0.0.40
codegen_flags: <defaults>
</compile_context>

<pallas_src>
import functools
import math

import jax
import jax.numpy as jnp
from jax.experimental import pallas as pl
from jax.experimental.pallas import tpu as pltpu

jax.config.update("jax_default_matmul_precision", "highest")

EPS = 1e-6          # VNLeakyReLU epsilon (module-level EPS in the PyTorch code)
NEG_SLOPE = 0.01    # negative slope of nn.LeakyReLU() and VNLeakyReLU
LN_EPS = 1e-5       # torch.nn.LayerNorm default eps


# --------------------------------------------------------------------------- #
# In-kernel helpers (feature-major: arrays are [features, tile] / [3, C, tile]) #
# --------------------------------------------------------------------------- #
def _vn_linear_fm(w, x):
    """VNLinear: x [3, C_in, t], w [C_out, C_in] -> [3, C_out, t]."""
    f32 = jnp.float32
    return jnp.stack([jnp.dot(w, x[c], preferred_element_type=f32) for c in range(3)],
                     axis=0)


def _gdb_linear_fm(sca_parts, vec, wv1, wv2, ws2v, ws2s, wg, bg):
    """GDBLinear (bottleneck=1) in feature-major layout.

    sca_parts: list of (W_s1_piece [shid, d_i], sca_piece [d_i, t]) -- lin_scalar_1
               split so callers never need an in-kernel concatenate.
    vec:       [3, in_v, t]
    Returns (out_scalar [out_s, t], out_vector [3, out_v, t]).
    """
    f32 = jnp.float32
    vint = _vn_linear_fm(wv1, vec)                               # [3, hid, t]
    vnorm = jnp.sqrt(jnp.sum(vint * vint, axis=0))               # [hid, t]
    z = jnp.dot(sca_parts[0][0], sca_parts[0][1], preferred_element_type=f32)
    for w_p, s_p in sca_parts[1:]:
        z = z + jnp.dot(w_p, s_p, preferred_element_type=f32)    # [shid, t]
    out_s = (jnp.dot(ws2v, vnorm, preferred_element_type=f32)
             + jnp.dot(ws2s, z, preferred_element_type=f32))     # [out_s, t]
    gate = jax.nn.sigmoid(jnp.dot(wg, out_s, preferred_element_type=f32) + bg)
    out_v = gate[None] * _vn_linear_fm(wv2, vint)                # [3, out_v, t]
    return out_s, out_v


def _vn_leaky_relu_fm(x, wd):
    """VNLeakyReLU: x [3, C, t]; wd [C, C] (per-channel dir) or [1, C] (shared)."""
    d = _vn_linear_fm(wd, x)                                     # [3, C or 1, t]
    dot = jnp.sum(x * d, axis=0)                                 # [C, t]
    dnsq = jnp.sum(d * d, axis=0)                                # [C or 1, t]
    mask = (dot >= 0).astype(x.dtype)
    proj = dot / (dnsq + EPS)
    return (NEG_SLOPE * x
            + (1.0 - NEG_SLOPE) * (mask[None] * x
                                   + (1.0 - mask[None]) * (x - proj[None] * d)))


def _leaky_relu(x):
    return jnp.where(x >= 0, x, NEG_SLOPE * x)


# --------------------------------------------------------------------------- #
# Kernel A: node_gblinear(x) + lin_k(x) fused (two GDBLinears, stacked weights) #
# --------------------------------------------------------------------------- #
def _node_pre_kernel(sca_ref, vec_ref,
                     wv1_ref, wv2_ref, ws1_ref, ws2v_ref, ws2s_ref, wg_ref, bg_ref,
                     sca_out_ref, vec_out_ref):
    sca = sca_ref[...]                                           # [hs, t]
    vec = vec_ref[...]                                           # [3, hv, t]
    for j in range(2):                                           # 0: node_gblinear, 1: lin_k
        o_s, o_v = _gdb_linear_fm([(ws1_ref[j], sca)], vec,
                                  wv1_ref[j], wv2_ref[j],
                                  ws2v_ref[j], ws2s_ref[j],
                                  wg_ref[j], bg_ref[j])
        sca_out_ref[j] = o_s.astype(sca_out_ref.dtype)
        vec_out_ref[j] = o_v.astype(vec_out_ref.dtype)


# --------------------------------------------------------------------------- #
# Kernel B: per-edge message + attention logits                                #
# --------------------------------------------------------------------------- #
def _edge_kernel(coeff, cutoff, annealing,
                 dist_ref, efeat_ref, evec_ref,
                 nsca_ref, nvec_ref, ksca_ref, kvec_ref,
                 off_ref, wexp_ref, pool_s_ref, pool_v_ref,
                 e_wv1, e_wv2, e_ws1g, e_ws1f, e_ws2v, e_ws2s, e_wg, e_bg, e_wd,
                 w_sca, b_sca, w_e2n, b_e2n, w_n2e, b_n2e, w_evn,
                 o_wv1, o_wv2, o_ws1, o_ws2v, o_ws2s, o_wg, o_bg,
                 msg_sca_ref, msg_vec_ref, a_sca_ref, a_vec_ref):
    f32 = jnp.float32
    dist = dist_ref[...]                                         # [1, t]

    # GaussianSmearing (kept un-concatenated; consumed only by edge_gbp lin_scalar_1)
    diff = dist - off_ref[...]                                   # [ng, t]
    gauss = jnp.exp(coeff * diff * diff)
    efeat = efeat_ref[...]                                       # [net, t]

    # EdgeExpansion: normalize edge vectors, expand with Linear(1, ec, bias=False)
    ev = evec_ref[...]                                           # [3, t]
    nrm = jnp.sqrt(jnp.sum(ev * ev, axis=0, keepdims=True))      # [1, t]
    evn = ev / (nrm + 1e-7)
    edge_vec = wexp_ref[...][None, :, :] * evn[:, None, :]       # [3, ec, t]

    # edge GDBPerceptronVN = GDBLinear + LeakyReLU + VNLeakyReLU
    gs, gv = _gdb_linear_fm([(e_ws1g[...], gauss), (e_ws1f[...], efeat)], edge_vec,
                            e_wv1[...], e_wv2[...], e_ws2v[...], e_ws2s[...],
                            e_wg[...], e_bg[...])
    gs = _leaky_relu(gs)
    gv = _vn_leaky_relu_fm(gv, e_wd[...])

    # MessageModule combine with gathered node features
    n_sca = nsca_ref[...]                                        # [hs, t]
    n_vec = nvec_ref[...]                                        # [3, hv, t]
    y_s = n_sca * (jnp.dot(w_sca[...], gs, preferred_element_type=f32) + b_sca[...])
    e2n = jnp.dot(w_e2n[...], gs, preferred_element_type=f32) + b_e2n[...]   # [hv, t]
    n2e = jnp.dot(w_n2e[...], n_sca, preferred_element_type=f32) + b_n2e[...]
    ev_lin = _vn_linear_fm(w_evn[...], gv)                        # [3, hv, t]
    y_v = e2n[None] * n_vec + n2e[None] * ev_lin

    msg_s, msg_v = _gdb_linear_fm([(o_ws1[...], y_s)], y_v,
                                  o_wv1[...], o_wv2[...], o_ws2v[...], o_ws2s[...],
                                  o_wg[...], o_bg[...])

    if annealing:
        c = 0.5 * (jnp.cos(dist * (math.pi / cutoff)) + 1.0)
        c = c * (dist <= cutoff).astype(f32) * (dist >= 0.0).astype(f32)
        msg_s = msg_s * c
        msg_v = msg_v * c[None]

    msg_sca_ref[...] = msg_s.astype(msg_sca_ref.dtype)
    msg_vec_ref[...] = msg_v.astype(msg_vec_ref.dtype)

    # Attention logits per head (head-pooling matmuls, no sublane-splitting reshapes)
    k_sca = ksca_ref[...]
    k_vec = kvec_ref[...]
    hs = msg_s.shape[0]
    hv = msg_v.shape[1]
    n_heads = pool_s_ref.shape[0]
    scale_s = 1.0 / float(hs // n_heads) ** 0.5
    scale_v = 1.0 / float(hv // n_heads) ** 0.5
    a_sca_ref[...] = (jnp.dot(pool_s_ref[...], msg_s * k_sca,
                              preferred_element_type=f32) * scale_s).astype(a_sca_ref.dtype)
    prod_v = jnp.sum(msg_v * k_vec, axis=0)                       # [hv, t]
    a_vec_ref[...] = (jnp.dot(pool_v_ref[...], prod_v,
                              preferred_element_type=f32) * scale_v).astype(a_vec_ref.dtype)


# --------------------------------------------------------------------------- #
# Kernel C: lin_v + residuals + LayerNorms + activations + out_transform       #
# --------------------------------------------------------------------------- #
def _node_post_kernel(x_sca_ref, x_vec_ref, m_sca_ref, m_vec_ref,
                      v_wv1, v_wv2, v_ws1, v_ws2v, v_ws2s, v_wg, v_bg,
                      lns_g, lns_b, lnv_g, lnv_b, wd_shared,
                      o_wv1, o_wv2, o_ws1, o_ws2v, o_ws2s, o_wg, o_bg,
                      sca_out_ref, vec_out_ref):
    x_sca = x_sca_ref[...]                                       # [hs, t]
    x_vec = x_vec_ref[...]                                       # [3, hv, t]

    # lin_v(x) root features (fused here so they never round-trip through HBM)
    root_s, root_v = _gdb_linear_fm([(v_ws1[...], x_sca)], x_vec,
                                    v_wv1[...], v_wv2[...], v_ws2v[...], v_ws2s[...],
                                    v_wg[...], v_bg[...])
    out_s = m_sca_ref[...] + root_s + x_sca
    out_v = m_vec_ref[...] + root_v + x_vec

    # LayerNorm over the scalar feature axis
    hs = out_s.shape[0]
    mu = jnp.sum(out_s, axis=0, keepdims=True) / hs
    dvs = out_s - mu
    var = jnp.sum(dvs * dvs, axis=0, keepdims=True) / hs
    ln_s = dvs / jnp.sqrt(var + LN_EPS) * lns_g[...] + lns_b[...]

    # LayerNorm over (channel, xyz) jointly
    hv = out_v.shape[1]
    mu_v = jnp.sum(jnp.sum(out_v, axis=0), axis=0, keepdims=True) / (3 * hv)    # [1, t]
    dvv = out_v - mu_v[None]
    var_v = jnp.sum(jnp.sum(dvv * dvv, axis=0), axis=0, keepdims=True) / (3 * hv)
    ln_v = dvv / jnp.sqrt(var_v[None] + LN_EPS) * lnv_g[...][:, :, None] + lnv_b[...][:, :, None]

    # activations + out_transform GDBLinear + final residual
    act_s = _leaky_relu(ln_s)
    act_v = _vn_leaky_relu_fm(ln_v, wd_shared[...])               # shared-dir VNLeakyReLU
    o_s, o_v = _gdb_linear_fm([(o_ws1[...], act_s)], act_v,
                              o_wv1[...], o_wv2[...], o_ws2v[...], o_ws2s[...],
                              o_wg[...], o_bg[...])
    sca_out_ref[...] = (o_s + ln_s).astype(sca_out_ref.dtype)
    vec_out_ref[...] = (o_v + ln_v).astype(vec_out_ref.dtype)


# --------------------------------------------------------------------------- #
# Wrapper utilities                                                            #
# --------------------------------------------------------------------------- #
def _round_up(n, m):
    return (n + m - 1) // m * m


def _pick_tile(n_padded):
    for t in (512, 256, 128):
        if n_padded % t == 0 and n_padded // t >= 2:
            return t
    return 128


def _pad_last(x, target):
    pad = target - x.shape[-1]
    if pad == 0:
        return x
    cfg = [(0, 0)] * (x.ndim - 1) + [(0, pad)]
    return jnp.pad(x, cfg)


def _const_spec(a):
    return pl.BlockSpec(a.shape, lambda i, _nd=a.ndim: (0,) * _nd)


def _tile_spec(shape, tile):
    blk = tuple(shape[:-1]) + (tile,)
    nd = len(shape)
    return pl.BlockSpec(blk, lambda i, _nd=nd: (0,) * (_nd - 1) + (i,))


def _call_kernel(kernel_fn, data_args, const_args, out_shapes, tile):
    grid = (data_args[0].shape[-1] // tile,)
    in_specs = ([_tile_spec(a.shape, tile) for a in data_args]
                + [_const_spec(a) for a in const_args])
    out_specs = [_tile_spec(s.shape, tile) for s in out_shapes]
    return pl.pallas_call(
        kernel_fn,
        out_shape=tuple(out_shapes),
        grid_spec=pltpu.PrefetchScalarGridSpec(
            num_scalar_prefetch=0, grid=grid,
            in_specs=in_specs, out_specs=out_specs),
        compiler_params=pltpu.CompilerParams(dimension_semantics=("parallel",)),
    )(*data_args, *const_args)


def _head_pool(num_heads, dim):
    per = dim // num_heads
    return (jnp.arange(dim)[None, :] // per == jnp.arange(num_heads)[:, None]).astype(jnp.float32)


def _gdb_fm(p):
    """Flatten GDBLinear params to feature-major kernel order (ws2 pre-split)."""
    hid = p["wv1"].shape[0]
    return [p["wv1"], p["wv2"], p["ws1"],
            p["ws2"][:, :hid], p["ws2"][:, hid:],
            p["wg"], p["bg"].reshape(-1, 1)]


def _gdb_fm_split_s1(p, ng):
    """Same, but lin_scalar_1 split into (gaussian | edge-type) halves."""
    hid = p["wv1"].shape[0]
    return [p["wv1"], p["wv2"], p["ws1"][:, :ng], p["ws1"][:, ng:],
            p["ws2"][:, :hid], p["ws2"][:, hid:],
            p["wg"], p["bg"].reshape(-1, 1)]


def _segment_softmax(x, seg, num_segments):
    m = jax.ops.segment_max(x, seg, num_segments=num_segments)
    m = jnp.where(jnp.isfinite(m), m, 0.0)
    e = jnp.exp(x - m[seg])
    s = jax.ops.segment_sum(e, seg, num_segments=num_segments)
    return e / s[seg]


# --------------------------------------------------------------------------- #
# Full forward                                                                 #
# --------------------------------------------------------------------------- #
def attention_interaction_block_vn(x_sca, x_vec, edge_index, edge_feature,
                                   edge_vector, edge_dist, params, *,
                                   num_heads, cutoff=10.0, annealing=False):
    f32 = jnp.float32
    N, hs = x_sca.shape
    hv = x_vec.shape[1]
    E = edge_dist.shape[0]
    ng = params["gauss_offset"].shape[0]
    H = num_heads
    row, col = edge_index[0], edge_index[1]

    Np = _round_up(N, 128)
    Ep = _round_up(E, 128)
    tn = _pick_tile(Np)
    te = _pick_tile(Ep)

    # feature-major node inputs (node dim on lanes)
    x_sca_fm = _pad_last(jnp.transpose(x_sca).astype(f32), Np)               # [hs, Np]
    x_vec_fm = _pad_last(jnp.transpose(x_vec, (2, 1, 0)).astype(f32), Np)    # [3, hv, Np]

    # ---- Kernel A: node_gblinear(x) + lin_k(x) --------------------------------
    w_a = [jnp.stack([a, b], axis=0) for a, b in zip(_gdb_fm(params["node_gbl"]),
                                                     _gdb_fm(params["lin_k"]))]
    pre_sca, pre_vec = _call_kernel(
        _node_pre_kernel, [x_sca_fm, x_vec_fm], w_a,
        [jax.ShapeDtypeStruct((2, hs, Np), f32),
         jax.ShapeDtypeStruct((2, 3, hv, Np), f32)], tn)

    # TODO(synk): gather / scatter_softmax / scatter_sum stay in XLA (irregular indexing).
    n_sca_col = jnp.take(pre_sca[0], col, axis=1)        # message-module node feats at col
    n_vec_col = jnp.take(pre_vec[0], col, axis=2)
    k_sca_row = jnp.take(pre_sca[1], row, axis=1)        # attention keys at row
    k_vec_row = jnp.take(pre_vec[1], row, axis=2)

    # feature-major edge inputs
    dist_fm = _pad_last(edge_dist.reshape(1, E).astype(f32), Ep)
    efeat_fm = _pad_last(jnp.transpose(edge_feature).astype(f32), Ep)
    evec_fm = _pad_last(jnp.transpose(edge_vector).astype(f32), Ep)
    n_sca_col = _pad_last(n_sca_col, Ep)
    n_vec_col = _pad_last(n_vec_col, Ep)
    k_sca_row = _pad_last(k_sca_row, Ep)
    k_vec_row = _pad_last(k_vec_row, Ep)

    const_b = ([params["gauss_offset"].reshape(ng, 1).astype(f32),
                params["edge_exp_w"].astype(f32),
                _head_pool(H, hs), _head_pool(H, hv)]
               + _gdb_fm_split_s1(params["edge_gbp"]["gdb"], ng)
               + [params["edge_gbp"]["vn_dir"],
                  params["sca_linear"]["w"], params["sca_linear"]["b"].reshape(-1, 1),
                  params["e2n"]["w"], params["e2n"]["b"].reshape(-1, 1),
                  params["n2e"]["w"], params["n2e"]["b"].reshape(-1, 1),
                  params["edge_vnlinear"]]
               + _gdb_fm(params["out_gbl"]))

    # ---- Kernel B: per-edge message + attention logits ------------------------
    msg_sca_fm, msg_vec_fm, a_sca_fm, a_vec_fm = _call_kernel(
        functools.partial(_edge_kernel, params["gauss_coeff"], cutoff, annealing),
        [dist_fm, efeat_fm, evec_fm, n_sca_col, n_vec_col, k_sca_row, k_vec_row],
        const_b,
        [jax.ShapeDtypeStruct((hs, Ep), f32),
         jax.ShapeDtypeStruct((3, hv, Ep), f32),
         jax.ShapeDtypeStruct((H, Ep), f32),
         jax.ShapeDtypeStruct((H, Ep), f32)], te)

    # ---- scatter softmax + weighted scatter-sum over edges (XLA segment ops) --
    a_s = _segment_softmax(jnp.transpose(a_sca_fm[:, :E]), row, N)            # [E, H]
    a_v = _segment_softmax(jnp.transpose(a_vec_fm[:, :E]), row, N)
    msg0 = jnp.transpose(msg_sca_fm[:, :E]).reshape(E, H, hs // H)
    msg1 = jnp.transpose(msg_vec_fm[:, :, :E], (2, 1, 0)).reshape(E, H, hv // H, 3)
    w0 = (a_s[..., None] * msg0).reshape(E, hs)
    w1 = (a_v[..., None, None] * msg1).reshape(E, hv, 3)
    sca_agg = jax.ops.segment_sum(w0, row, num_segments=N)                    # [N, hs]
    vec_agg = jax.ops.segment_sum(w1, row, num_segments=N)                    # [N, hv, 3]

    # ---- Kernel C: lin_v + residuals + LayerNorms + acts + out_transform ------
    msg_sca_n = _pad_last(jnp.transpose(sca_agg), Np)                         # [hs, Np]
    msg_vec_n = _pad_last(jnp.transpose(vec_agg, (2, 1, 0)), Np)              # [3, hv, Np]
    const_c = (_gdb_fm(params["lin_v"])
               + [params["ln_sca"]["g"].reshape(-1, 1), params["ln_sca"]["b"].reshape(-1, 1),
                  jnp.transpose(params["ln_vec"]["g"]), jnp.transpose(params["ln_vec"]["b"]),
                  params["act_vec_dir"]]
               + _gdb_fm(params["out_transform"]))
    out_sca_fm, out_vec_fm = _call_kernel(
        _node_post_kernel,
        [x_sca_fm, x_vec_fm, msg_sca_n, msg_vec_n], const_c,
        [jax.ShapeDtypeStruct((hs, Np), f32),
         jax.ShapeDtypeStruct((3, hv, Np), f32)], tn)

    out_sca = jnp.transpose(out_sca_fm[:, :N])                                # [N, hs]
    out_vec = jnp.transpose(out_vec_fm[:, :, :N], (2, 1, 0))                  # [N, hv, 3]
    return out_sca, out_vec


# --------------------------------------------------------------------------- #
# Plain-JAX reference (node-major, mirrors the PyTorch forward)                #
# --------------------------------------------------------------------------- #
def _gdb_linear_ref(sca, vec, p):
    vint = jnp.einsum("oh,nhc->noc", p["wv1"], vec)
    vnorm = jnp.sqrt(jnp.sum(vint * vint, axis=-1))
    z = sca @ p["ws1"].T
    cat = jnp.concatenate([vnorm, z], axis=-1)
    out_s = cat @ p["ws2"].T
    gate = jax.nn.sigmoid(out_s @ p["wg"].T + p["bg"])
    out_v = gate[..., None] * jnp.einsum("oh,nhc->noc", p["wv2"], vint)
    return out_s, out_v


def _vn_leaky_relu_ref(x, wd):
    d = jnp.einsum("oh,nhc->noc", wd, x)
    dot = jnp.sum(x * d, axis=-1, keepdims=True)
    mask = (dot >= 0).astype(x.dtype)
    dnsq = jnp.sum(d * d, axis=-1, keepdims=True)
    return NEG_SLOPE * x + (1 - NEG_SLOPE) * (mask * x + (1 - mask) * (x - dot / (dnsq + EPS) * d))


def _reference(x_sca, x_vec, edge_index, edge_feature, edge_vector, edge_dist,
               p, num_heads, cutoff, annealing):
    row, col = edge_index[0], edge_index[1]
    N, hs = x_sca.shape
    hv = x_vec.shape[1]
    E = edge_dist.shape[0]
    H = num_heads

    off = p["gauss_offset"]
    gauss = jnp.exp(p["gauss_coeff"] * (edge_dist[:, None] - off[None, :]) ** 2)
    edge_sca_feat = jnp.concatenate([gauss, edge_feature], axis=-1)
    ev = edge_vector / (jnp.linalg.norm(edge_vector, axis=-1, keepdims=True) + 1e-7)
    edge_vec_feat = ev[:, None, :] * p["edge_exp_w"][None, :, :]

    ns, nv = _gdb_linear_ref(x_sca, x_vec, p["node_gbl"])
    ns, nv = ns[col], nv[col]
    es, evf = _gdb_linear_ref(edge_sca_feat, edge_vec_feat, p["edge_gbp"]["gdb"])
    es = jnp.where(es >= 0, es, NEG_SLOPE * es)
    evf = _vn_leaky_relu_ref(evf, p["edge_gbp"]["vn_dir"])
    y_s = ns * (es @ p["sca_linear"]["w"].T + p["sca_linear"]["b"])
    y_v = ((es @ p["e2n"]["w"].T + p["e2n"]["b"])[..., None] * nv
           + (ns @ p["n2e"]["w"].T + p["n2e"]["b"])[..., None]
           * jnp.einsum("oh,nhc->noc", p["edge_vnlinear"], evf))
    msg_s, msg_v = _gdb_linear_ref(y_s, y_v, p["out_gbl"])
    if annealing:
        c = 0.5 * (jnp.cos(edge_dist * math.pi / cutoff) + 1.0)
        c = c * (edge_dist <= cutoff) * (edge_dist >= 0.0)
        msg_s = msg_s * c[:, None]
        msg_v = msg_v * c[:, None, None]

    k_s, k_v = _gdb_linear_ref(x_sca, x_vec, p["lin_k"])
    m0 = msg_s.reshape(E, H, hs // H)
    m1 = msg_v.reshape(E, H, hv // H, 3)
    k0 = k_s[row].reshape(E, H, hs // H)
    k1 = k_v[row].reshape(E, H, hv // H, 3)
    a0 = jnp.sum(m0 * k0, axis=-1) / float(hs // H) ** 0.5
    a1 = jnp.sum(m1 * k1, axis=(-1, -2)) / float(hv // H) ** 0.5
    a0 = _segment_softmax(a0, row, N)
    a1 = _segment_softmax(a1, row, N)
    sca_msg = jax.ops.segment_sum((a0[..., None] * m0).reshape(E, hs), row, num_segments=N)
    vec_msg = jax.ops.segment_sum((a1[..., None, None] * m1).reshape(E, hv, 3), row,
                                  num_segments=N)
    v_s, v_v = _gdb_linear_ref(x_sca, x_vec, p["lin_v"])
    out_s = sca_msg + v_s + x_sca
    out_v = vec_msg + v_v + x_vec

    mu = out_s.mean(-1, keepdims=True)
    var = out_s.var(-1, keepdims=True)
    ln_s = (out_s - mu) / jnp.sqrt(var + LN_EPS) * p["ln_sca"]["g"] + p["ln_sca"]["b"]
    mu_v = out_v.mean(axis=(-2, -1), keepdims=True)
    var_v = out_v.var(axis=(-2, -1), keepdims=True)
    ln_v = (out_v - mu_v) / jnp.sqrt(var_v + LN_EPS) * p["ln_vec"]["g"] + p["ln_vec"]["b"]

    act_s = jnp.where(ln_s >= 0, ln_s, NEG_SLOPE * ln_s)
    act_v = _vn_leaky_relu_ref(ln_v, p["act_vec_dir"])
    o_s, o_v = _gdb_linear_ref(act_s, act_v, p["out_transform"])
    return o_s + ln_s, o_v + ln_v


# --------------------------------------------------------------------------- #
# Parameter construction (bottleneck=1 variant)                                #
# --------------------------------------------------------------------------- #
def _make_gdb(key, in_s, in_v, out_s, out_v, scale=0.2):
    hid = max(in_v, out_v)
    shid = max(in_v, out_v)
    ks = jax.random.split(key, 6)
    rnd = lambda k, shape: scale * jax.random.normal(k, shape, jnp.float32)
    return dict(wv1=rnd(ks[0], (hid, in_v)), wv2=rnd(ks[1], (out_v, hid)),
                ws1=rnd(ks[2], (shid, in_s)), ws2=rnd(ks[3], (out_s, hid + shid)),
                wg=rnd(ks[4], (out_v, out_s)), bg=rnd(ks[5], (out_v,)))


def _make_params(key, hs, hv, ec, net, cutoff=10.0):
    ng = ec - net
    ks = jax.random.split(key, 20)
    rnd = lambda k, shape, s=0.2: s * jax.random.normal(k, shape, jnp.float32)
    offset = jnp.linspace(0.0, cutoff, ng).astype(jnp.float32)
    coeff = float(-0.5 / float(offset[1] - offset[0]) ** 2)
    return dict(
        gauss_offset=offset, gauss_coeff=coeff,
        edge_exp_w=rnd(ks[0], (ec, 1), 0.5),
        node_gbl=_make_gdb(ks[1], hs, hv, hs, hv),
        lin_k=_make_gdb(ks[2], hs, hv, hs, hv),
        lin_v=_make_gdb(ks[3], hs, hv, hs, hv),
        edge_gbp=dict(gdb=_make_gdb(ks[4], ec, ec, ec, ec), vn_dir=rnd(ks[5], (ec, ec))),
        sca_linear=dict(w=rnd(ks[6], (hs, ec)), b=rnd(ks[7], (hs,))),
        e2n=dict(w=rnd(ks[8], (hv, ec)), b=rnd(ks[9], (hv,))),
        n2e=dict(w=rnd(ks[10], (hv, hs)), b=rnd(ks[11], (hv,))),
        edge_vnlinear=rnd(ks[12], (hv, ec)),
        out_gbl=_make_gdb(ks[13], hs, hv, hs, hv),
        ln_sca=dict(g=1.0 + 0.1 * jax.random.normal(ks[14], (hs,), jnp.float32),
                    b=0.1 * jax.random.normal(ks[15], (hs,), jnp.float32)),
        ln_vec=dict(g=1.0 + 0.1 * jax.random.normal(ks[16], (hv, 3), jnp.float32),
                    b=0.1 * jax.random.normal(ks[17], (hv, 3), jnp.float32)),
        act_vec_dir=rnd(ks[18], (1, hv), 0.5),
        out_transform=_make_gdb(ks[19], hs, hv, hs, hv),
    )


if __name__ == "__main__":
    key = jax.random.PRNGKey(0)
    N, E = 256, 512
    hs, hv = 32, 8            # hidden_channels = (32, 8)
    ec, net = 16, 4           # edge_channels, num_edge_types
    H = 4                     # num_heads
    cutoff = 10.0

    k1, k2, k3, k4, k5, k6, kp = jax.random.split(key, 7)
    x_sca = jax.random.normal(k1, (N, hs), jnp.float32)
    x_vec = jax.random.normal(k2, (N, hv, 3), jnp.float32)
    edge_index = jax.random.randint(k3, (2, E), 0, N)
    edge_feature = jax.nn.one_hot(jax.random.randint(k4, (E,), 0, net), net,
                                  dtype=jnp.float32)
    edge_vector = jax.random.normal(k5, (E, 3), jnp.float32)
    edge_dist = jax.random.uniform(k6, (E,), jnp.float32, 0.1, cutoff * 1.2)
    params = _make_params(kp, hs, hv, ec, net, cutoff=cutoff)

    out_sca, out_vec = attention_interaction_block_vn(
        x_sca, x_vec, edge_index, edge_feature, edge_vector, edge_dist, params,
        num_heads=H, cutoff=cutoff, annealing=True)
    jax.block_until_ready((out_sca, out_vec))

    ref_sca, ref_vec = _reference(x_sca, x_vec, edge_index, edge_feature, edge_vector,
                                  edge_dist, params, H, cutoff, True)

    assert out_sca.shape == (N, hs)
    assert out_vec.shape == (N, hv, 3)
    assert jnp.allclose(out_sca, ref_sca, atol=1e-4, rtol=1e-4), (
        float(jnp.max(jnp.abs(out_sca - ref_sca))))
    assert jnp.allclose(out_vec, ref_vec, atol=1e-4, rtol=1e-4), (
        float(jnp.max(jnp.abs(out_vec - ref_vec))))
    print("KERNEL_OK")
</pallas_src>

<mosaic_0001>
module attributes {stable_mosaic.version = 11 : i64} {
  func.func @_node_pre_kernel(%arg0: i32, %arg1: memref<32x128xf32, #tpu.memory_space<vmem>>, %arg2: memref<3x8x128xf32, #tpu.memory_space<vmem>>, %arg3: memref<2x8x8xf32, #tpu.memory_space<vmem>>, %arg4: memref<2x8x8xf32, #tpu.memory_space<vmem>>, %arg5: memref<2x8x32xf32, #tpu.memory_space<vmem>>, %arg6: memref<2x32x8xf32, #tpu.memory_space<vmem>>, %arg7: memref<2x32x8xf32, #tpu.memory_space<vmem>>, %arg8: memref<2x8x32xf32, #tpu.memory_space<vmem>>, %arg9: memref<2x8x1xf32, #tpu.memory_space<vmem>>, %arg10: memref<2x32x128xf32, #tpu.memory_space<vmem>>, %arg11: memref<2x3x8x128xf32, #tpu.memory_space<vmem>>) attributes {dimension_semantics = [#tpu.dimension_semantics<parallel>], iteration_bounds = array<i64: 2>, scalar_prefetch = 0 : i64, scratch_operands = 0 : i64, tpu.core_type = #tpu.core_type<tc>, window_params = [{transform_indices = @transform_0, window_bounds = array<i64: 32, 128>}, {transform_indices = @transform_1, window_bounds = array<i64: 3, 8, 128>}, {pipeline_mode = #tpu.pipeline_mode<synchronous>, transform_indices = @transform_2, window_bounds = array<i64: 2, 8, 8>}, {pipeline_mode = #tpu.pipeline_mode<synchronous>, transform_indices = @transform_3, window_bounds = array<i64: 2, 8, 8>}, {pipeline_mode = #tpu.pipeline_mode<synchronous>, transform_indices = @transform_4, window_bounds = array<i64: 2, 8, 32>}, {pipeline_mode = #tpu.pipeline_mode<synchronous>, transform_indices = @transform_5, window_bounds = array<i64: 2, 32, 8>}, {pipeline_mode = #tpu.pipeline_mode<synchronous>, transform_indices = @transform_6, window_bounds = array<i64: 2, 32, 8>}, {pipeline_mode = #tpu.pipeline_mode<synchronous>, transform_indices = @transform_7, window_bounds = array<i64: 2, 8, 32>}, {pipeline_mode = #tpu.pipeline_mode<synchronous>, transform_indices = @transform_8, window_bounds = array<i64: 2, 8, 1>}, {transform_indices = @transform_9, window_bounds = array<i64: 2, 32, 128>}, {transform_indices = @transform_10, window_bounds = array<i64: 2, 3, 8, 128>}]} {
    %c0 = arith.constant 0 : index
    %c0_0 = arith.constant 0 : index
    %0 = vector.load %arg1[%c0, %c0_0] : memref<32x128xf32, #tpu.memory_space<vmem>>, vector<32x128xf32>
    %c0_1 = arith.constant 0 : index
    %c0_2 = arith.constant 0 : index
    %c0_3 = arith.constant 0 : index
    %1 = vector.load %arg2[%c0_1, %c0_2, %c0_3] : memref<3x8x128xf32, #tpu.memory_space<vmem>>, vector<3x8x128xf32>
    %c0_4 = arith.constant 0 : index
    %c0_5 = arith.constant 0 : index
    %c0_6 = arith.constant 0 : index
    %2 = vector.load %arg5[%c0_4, %c0_5, %c0_6] : memref<2x8x32xf32, #tpu.memory_space<vmem>>, vector<1x8x32xf32>
    %3 = vector.shape_cast %2 : vector<1x8x32xf32> to vector<8x32xf32>
    %c0_7 = arith.constant 0 : index
    %c0_8 = arith.constant 0 : index
    %c0_9 = arith.constant 0 : index
    %4 = vector.load %arg3[%c0_7, %c0_8, %c0_9] : memref<2x8x8xf32, #tpu.memory_space<vmem>>, vector<1x8x8xf32>
    %5 = vector.shape_cast %4 : vector<1x8x8xf32> to vector<8x8xf32>
    %c0_10 = arith.constant 0 : index
    %c0_11 = arith.constant 0 : index
    %c0_12 = arith.constant 0 : index
    %6 = vector.load %arg4[%c0_10, %c0_11, %c0_12] : memref<2x8x8xf32, #tpu.memory_space<vmem>>, vector<1x8x8xf32>
    %7 = vector.shape_cast %6 : vector<1x8x8xf32> to vector<8x8xf32>
    %c0_13 = arith.constant 0 : index
    %c0_14 = arith.constant 0 : index
    %c0_15 = arith.constant 0 : index
    %8 = vector.load %arg6[%c0_13, %c0_14, %c0_15] : memref<2x32x8xf32, #tpu.memory_space<vmem>>, vector<1x32x8xf32>
    %9 = vector.shape_cast %8 : vector<1x32x8xf32> to vector<32x8xf32>
    %c0_16 = arith.constant 0 : index
    %c0_17 = arith.constant 0 : index
    %c0_18 = arith.constant 0 : index
    %10 = vector.load %arg7[%c0_16, %c0_17, %c0_18] : memref<2x32x8xf32, #tpu.memory_space<vmem>>, vector<1x32x8xf32>
    %11 = vector.shape_cast %10 : vector<1x32x8xf32> to vector<32x8xf32>
    %c0_19 = arith.constant 0 : index
    %c0_20 = arith.constant 0 : index
    %c0_21 = arith.constant 0 : index
    %12 = vector.load %arg8[%c0_19, %c0_20, %c0_21] : memref<2x8x32xf32, #tpu.memory_space<vmem>>, vector<1x8x32xf32>
    %13 = vector.shape_cast %12 : vector<1x8x32xf32> to vector<8x32xf32>
    %c0_22 = arith.constant 0 : index
    %c0_23 = arith.constant 0 : index
    %c0_24 = arith.constant 0 : index
    %14 = vector.load %arg9[%c0_22, %c0_23, %c0_24] : memref<2x8x1xf32, #tpu.memory_space<vmem>>, vector<1x8x1xf32>
    %15 = vector.shape_cast %14 : vector<1x8x1xf32> to vector<8x1xf32>
    %16 = vector.extract_strided_slice %1 {offsets = [0, 0, 0], sizes = [1, 8, 128], strides = [1, 1, 1]} : vector<3x8x128xf32> to vector<1x8x128xf32>
    %17 = vector.shape_cast %16 : vector<1x8x128xf32> to vector<8x128xf32>
    %cst = arith.constant dense<0.000000e+00> : vector<8x128xf32>
    %18 = tpu.matmul %5, %17, %cst {dimension_numbers = #tpu.dot_dimension_numbers<[1], [0], [0], [1], [0, 0, 1, 1], [], []>, precision = #tpu.contract_precision<fp32>} : vector<8x8xf32>, vector<8x128xf32>, vector<8x128xf32> -> vector<8x128xf32>
    %19 = vector.extract_strided_slice %1 {offsets = [1, 0, 0], sizes = [1, 8, 128], strides = [1, 1, 1]} : vector<3x8x128xf32> to vector<1x8x128xf32>
    %20 = vector.shape_cast %19 : vector<1x8x128xf32> to vector<8x128xf32>
    %cst_25 = arith.constant dense<0.000000e+00> : vector<8x128xf32>
    %21 = tpu.matmul %5, %20, %cst_25 {dimension_numbers = #tpu.dot_dimension_numbers<[1], [0], [0], [1], [0, 0, 1, 1], [], []>, precision = #tpu.contract_precision<fp32>} : vector<8x8xf32>, vector<8x128xf32>, vector<8x128xf32> -> vector<8x128xf32>
    %22 = vector.extract_strided_slice %1 {offsets = [2, 0, 0], sizes = [1, 8, 128], strides = [1, 1, 1]} : vector<3x8x128xf32> to vector<1x8x128xf32>
    %23 = vector.shape_cast %22 : vector<1x8x128xf32> to vector<8x128xf32>
    %cst_26 = arith.constant dense<0.000000e+00> : vector<8x128xf32>
    %24 = tpu.matmul %5, %23, %cst_26 {dimension_numbers = #tpu.dot_dimension_numbers<[1], [0], [0], [1], [0, 0, 1, 1], [], []>, precision = #tpu.contract_precision<fp32>} : vector<8x8xf32>, vector<8x128xf32>, vector<8x128xf32> -> vector<8x128xf32>
    %25 = vector.shape_cast %18 : vector<8x128xf32> to vector<1x8x128xf32>
    %26 = vector.shape_cast %21 : vector<8x128xf32> to vector<1x8x128xf32>
    %27 = vector.shape_cast %24 : vector<8x128xf32> to vector<1x8x128xf32>
    %28 = tpu.concatenate %25, %26, %27 in 0 : vector<1x8x128xf32>, vector<1x8x128xf32>, vector<1x8x128xf32> -> vector<3x8x128xf32>
    %29 = arith.mulf %28, %28 : vector<3x8x128xf32>
    %cst_27 = arith.constant dense<0.000000e+00> : vector<8x128xf32>
    %30 = vector.multi_reduction <add>, %29, %cst_27 [0] : vector<3x8x128xf32> to vector<8x128xf32>
    %31 = math.sqrt %30 : vector<8x128xf32>
    %cst_28 = arith.constant dense<0.000000e+00> : vector<8x128xf32>
    %32 = tpu.matmul %3, %0, %cst_28 {dimension_numbers = #tpu.dot_dimension_numbers<[1], [0], [0], [1], [0, 0, 1, 1], [], []>, precision = #tpu.contract_precision<fp32>} : vector<8x32xf32>, vector<32x128xf32>, vector<8x128xf32> -> vector<8x128xf32>
    %cst_29 = arith.constant dense<0.000000e+00> : vector<32x128xf32>
    %33 = tpu.matmul %9, %31, %cst_29 {dimension_numbers = #tpu.dot_dimension_numbers<[1], [0], [0], [1], [0, 0, 1, 1], [], []>, precision = #tpu.contract_precision<fp32>} : vector<32x8xf32>, vector<8x128xf32>, vector<32x128xf32> -> vector<32x128xf32>
    %cst_30 = arith.constant dense<0.000000e+00> : vector<32x128xf32>
    %34 = tpu.matmul %11, %32, %cst_30 {dimension_numbers = #tpu.dot_dimension_numbers<[1], [0], [0], [1], [0, 0, 1, 1], [], []>, precision = #tpu.contract_precision<fp32>} : vector<32x8xf32>, vector<8x128xf32>, vector<32x128xf32> -> vector<32x128xf32>
    %35 = arith.addf %33, %34 : vector<32x128xf32>
    %cst_31 = arith.constant dense<0.000000e+00> : vector<8x128xf32>
    %36 = tpu.matmul %13, %35, %cst_31 {dimension_numbers = #tpu.dot_dimension_numbers<[1], [0], [0], [1], [0, 0, 1, 1], [], []>, precision = #tpu.contract_precision<fp32>} : vector<8x32xf32>, vector<32x128xf32>, vector<8x128xf32> -> vector<8x128xf32>
    %37 = vector.broadcast %15 : vector<8x1xf32> to vector<8x128xf32>
    %38 = arith.addf %36, %37 : vector<8x128xf32>
    %39 = arith.negf %38 : vector<8x128xf32>
    %40 = math.exp %39 : vector<8x128xf32>
    %cst_32 = arith.constant 1.000000e+00 : f32
    %41 = vector.broadcast %cst_32 : f32 to vector<8x128xf32>
    %42 = arith.addf %41, %40 : vector<8x128xf32>
    %43 = arith.divf %41, %42 : vector<8x128xf32>
    %44 = vector.shape_cast %43 : vector<8x128xf32> to vector<1x8x128xf32>
    %45 = vector.extract_strided_slice %28 {offsets = [0, 0, 0], sizes = [1, 8, 128], strides = [1, 1, 1]} : vector<3x8x128xf32> to vector<1x8x128xf32>
    %46 = vector.shape_cast %45 : vector<1x8x128xf32> to vector<8x128xf32>
    %cst_33 = arith.constant dense<0.000000e+00> : vector<8x128xf32>
    %47 = tpu.matmul %7, %46, %cst_33 {dimension_numbers = #tpu.dot_dimension_numbers<[1], [0], [0], [1], [0, 0, 1, 1], [], []>, precision = #tpu.contract_precision<fp32>} : vector<8x8xf32>, vector<8x128xf32>, vector<8x128xf32> -> vector<8x128xf32>
    %48 = vector.extract_strided_slice %28 {offsets = [1, 0, 0], sizes = [1, 8, 128], strides = [1, 1, 1]} : vector<3x8x128xf32> to vector<1x8x128xf32>
    %49 = vector.shape_cast %48 : vector<1x8x128xf32> to vector<8x128xf32>
    %cst_34 = arith.constant dense<0.000000e+00> : vector<8x128xf32>
    %50 = tpu.matmul %7, %49, %cst_34 {dimension_numbers = #tpu.dot_dimension_numbers<[1], [0], [0], [1], [0, 0, 1, 1], [], []>, precision = #tpu.contract_precision<fp32>} : vector<8x8xf32>, vector<8x128xf32>, vector<8x128xf32> -> vector<8x128xf32>
    %51 = vector.extract_strided_slice %28 {offsets = [2, 0, 0], sizes = [1, 8, 128], strides = [1, 1, 1]} : vector<3x8x128xf32> to vector<1x8x128xf32>
    %52 = vector.shape_cast %51 : vector<1x8x128xf32> to vector<8x128xf32>
    %cst_35 = arith.constant dense<0.000000e+00> : vector<8x128xf32>
    %53 = tpu.matmul %7, %52, %cst_35 {dimension_numbers = #tpu.dot_dimension_numbers<[1], [0], [0], [1], [0, 0, 1, 1], [], []>, precision = #tpu.contract_precision<fp32>} : vector<8x8xf32>, vector<8x128xf32>, vector<8x128xf32> -> vector<8x128xf32>
    %54 = vector.shape_cast %47 : vector<8x128xf32> to vector<1x8x128xf32>
    %55 = vector.shape_cast %50 : vector<8x128xf32> to vector<1x8x128xf32>
    %56 = vector.shape_cast %53 : vector<8x128xf32> to vector<1x8x128xf32>
    %57 = tpu.concatenate %54, %55, %56 in 0 : vector<1x8x128xf32>, vector<1x8x128xf32>, vector<1x8x128xf32> -> vector<3x8x128xf32>
    %58 = vector.broadcast %44 : vector<1x8x128xf32> to vector<3x8x128xf32>
    %59 = arith.mulf %58, %57 : vector<3x8x128xf32>
    %c0_36 = arith.constant 0 : index
    %c0_37 = arith.constant 0 : index
    %c0_38 = arith.constant 0 : index
    %60 = vector.load %arg10[%c0_36, %c0_37, %c0_38] : memref<2x32x128xf32, #tpu.memory_space<vmem>>, vector<1x32x128xf32>
    %61 = vector.shape_cast %60 : vector<1x32x128xf32> to vector<32x128xf32>
    %62 = vector.shape_cast %35 : vector<32x128xf32> to vector<1x32x128xf32>
    tpu.vector_store %arg10[%c0_36, %c0_37, %c0_38], %62 {strides = array<i32>} : memref<2x32x128xf32, #tpu.memory_space<vmem>>, vector<1x32x128xf32>,
    %c0_39 = arith.constant 0 : index
    %c0_40 = arith.constant 0 : index
    %c0_41 = arith.constant 0 : index
    %c0_42 = arith.constant 0 : index
    %63 = vector.load %arg11[%c0_39, %c0_40, %c0_41, %c0_42] : memref<2x3x8x128xf32, #tpu.memory_space<vmem>>, vector<1x3x8x128xf32>
    %64 = vector.shape_cast %63 : vector<1x3x8x128xf32> to vector<3x8x128xf32>
    %65 = vector.shape_cast %59 : vector<3x8x128xf32> to vector<1x3x8x128xf32>
    tpu.vector_store %arg11[%c0_39, %c0_40, %c0_41, %c0_42], %65 {strides = array<i32>} : memref<2x3x8x128xf32, #tpu.memory_space<vmem>>, vector<1x3x8x128xf32>,
    %c1 = arith.constant 1 : index
    %c0_43 = arith.constant 0 : index
    %c0_44 = arith.constant 0 : index
    %66 = vector.load %arg5[%c1, %c0_43, %c0_44] : memref<2x8x32xf32, #tpu.memory_space<vmem>>, vector<1x8x32xf32>
    %67 = vector.shape_cast %66 : vector<1x8x32xf32> to vector<8x32xf32>
    %c1_45 = arith.constant 1 : index
    %c0_46 = arith.constant 0 : index
    %c0_47 = arith.constant 0 : index
    %68 = vector.load %arg3[%c1_45, %c0_46, %c0_47] : memref<2x8x8xf32, #tpu.memory_space<vmem>>, vector<1x8x8xf32>
    %69 = vector.shape_cast %68 : vector<1x8x8xf32> to vector<8x8xf32>
    %c1_48 = arith.constant 1 : index
    %c0_49 = arith.constant 0 : index
    %c0_50 = arith.constant 0 : index
    %70 = vector.load %arg4[%c1_48, %c0_49, %c0_50] : memref<2x8x8xf32, #tpu.memory_space<vmem>>, vector<1x8x8xf32>
    %71 = vector.shape_cast %70 : vector<1x8x8xf32> to vector<8x8xf32>
    %c1_51 = arith.constant 1 : index
    %c0_52 = arith.constant 0 : index
    %c0_53 = arith.constant 0 : index
    %72 = vector.load %arg6[%c1_51, %c0_52, %c0_53] : memref<2x32x8xf32, #tpu.memory_space<vmem>>, vector<1x32x8xf32>
    %73 = vector.shape_cast %72 : vector<1x32x8xf32> to vector<32x8xf32>
    %c1_54 = arith.constant 1 : index
    %c0_55 = arith.constant 0 : index
    %c0_56 = arith.constant 0 : index
    %74 = vector.load %arg7[%c1_54, %c0_55, %c0_56] : memref<2x32x8xf32, #tpu.memory_space<vmem>>, vector<1x32x8xf32>
    %75 = vector.shape_cast %74 : vector<1x32x8xf32> to vector<32x8xf32>
    %c1_57 = arith.constant 1 : index
    %c0_58 = arith.constant 0 : index
    %c0_59 = arith.constant 0 : index
    %76 = vector.load %arg8[%c1_57, %c0_58, %c0_59] : memref<2x8x32xf32, #tpu.memory_space<vmem>>, vector<1x8x32xf32>
    %77 = vector.shape_cast %76 : vector<1x8x32xf32> to vector<8x32xf32>
    %c1_60 = arith.constant 1 : index
    %c0_61 = arith.constant 0 : index
    %c0_62 = arith.constant 0 : index
    %78 = vector.load %arg9[%c1_60, %c0_61, %c0_62] : memref<2x8x1xf32, #tpu.memory_space<vmem>>, vector<1x8x1xf32>
    %79 = vector.shape_cast %78 : vector<1x8x1xf32> to vector<8x1xf32>
    %80 = vector.extract_strided_slice %1 {offsets = [0, 0, 0], sizes = [1, 8, 128], strides = [1, 1, 1]} : vector<3x8x128xf32> to vector<1x8x128xf32>
    %81 = vector.shape_cast %80 : vector<1x8x128xf32> to vector<8x128xf32>
    %cst_63 = arith.constant dense<0.000000e+00> : vector<8x128xf32>
    %82 = tpu.matmul %69, %81, %cst_63 {dimension_numbers = #tpu.dot_dimension_numbers<[1], [0], [0], [1], [0, 0, 1, 1], [], []>, precision = #tpu.contract_precision<fp32>} : vector<8x8xf32>, vector<8x128xf32>, vector<8x128xf32> -> vector<8x128xf32>
    %83 = vector.extract_strided_slice %1 {offsets = [1, 0, 0], sizes = [1, 8, 128], strides = [1, 1, 1]} : vector<3x8x128xf32> to vector<1x8x128xf32>
    %84 = vector.shape_cast %83 : vector<1x8x128xf32> to vector<8x128xf32>
    %cst_64 = arith.constant dense<0.000000e+00> : vector<8x128xf32>
    %85 = tpu.matmul %69, %84, %cst_64 {dimension_numbers = #tpu.dot_dimension_numbers<[1], [0], [0], [1], [0, 0, 1, 1], [], []>, precision = #tpu.contract_precision<fp32>} : vector<8x8xf32>, vector<8x128xf32>, vector<8x128xf32> -> vector<8x128xf32>
    %86 = vector.extract_strided_slice %1 {offsets = [2, 0, 0], sizes = [1, 8, 128], strides = [1, 1, 1]} : vector<3x8x128xf32> to vector<1x8x128xf32>
    %87 = vector.shape_cast %86 : vector<1x8x128xf32> to vector<8x128xf32>
    %cst_65 = arith.constant dense<0.000000e+00> : vector<8x128xf32>
    %88 = tpu.matmul %69, %87, %cst_65 {dimension_numbers = #tpu.dot_dimension_numbers<[1], [0], [0], [1], [0, 0, 1, 1], [], []>, precision = #tpu.contract_precision<fp32>} : vector<8x8xf32>, vector<8x128xf32>, vector<8x128xf32> -> vector<8x128xf32>
    %89 = vector.shape_cast %82 : vector<8x128xf32> to vector<1x8x128xf32>
    %90 = vector.shape_cast %85 : vector<8x128xf32> to vector<1x8x128xf32>
    %91 = vector.shape_cast %88 : vector<8x128xf32> to vector<1x8x128xf32>
    %92 = tpu.concatenate %89, %90, %91 in 0 : vector<1x8x128xf32>, vector<1x8x128xf32>, vector<1x8x128xf32> -> vector<3x8x128xf32>
    %93 = arith.mulf %92, %92 : vector<3x8x128xf32>
    %cst_66 = arith.constant dense<0.000000e+00> : vector<8x128xf32>
    %94 = vector.multi_reduction <add>, %93, %cst_66 [0] : vector<3x8x128xf32> to vector<8x128xf32>
    %95 = math.sqrt %94 : vector<8x128xf32>
    %cst_67 = arith.constant dense<0.000000e+00> : vector<8x128xf32>
    %96 = tpu.matmul %67, %0, %cst_67 {dimension_numbers = #tpu.dot_dimension_numbers<[1], [0], [0], [1], [0, 0, 1, 1], [], []>, precision = #tpu.contract_precision<fp32>} : vector<8x32xf32>, vector<32x128xf32>, vector<8x128xf32> -> vector<8x128xf32>
    %cst_68 = arith.constant dense<0.000000e+00> : vector<32x128xf32>
    %97 = tpu.matmul %73, %95, %cst_68 {dimension_numbers = #tpu.dot_dimension_numbers<[1], [0], [0], [1], [0, 0, 1, 1], [], []>, precision = #tpu.contract_precision<fp32>} : vector<32x8xf32>, vector<8x128xf32>, vector<32x128xf32> -> vector<32x128xf32>
    %cst_69 = arith.constant dense<0.000000e+00> : vector<32x128xf32>
    %98 = tpu.matmul %75, %96, %cst_69 {dimension_numbers = #tpu.dot_dimension_numbers<[1], [0], [0], [1], [0, 0, 1, 1], [], []>, precision = #tpu.contract_precision<fp32>} : vector<32x8xf32>, vector<8x128xf32>, vector<32x128xf32> -> vector<32x128xf32>
    %99 = arith.addf %97, %98 : vector<32x128xf32>
    %cst_70 = arith.constant dense<0.000000e+00> : vector<8x128xf32>
    %100 = tpu.matmul %77, %99, %cst_70 {dimension_numbers = #tpu.dot_dimension_numbers<[1], [0], [0], [1], [0, 0, 1, 1], [], []>, precision = #tpu.contract_precision<fp32>} : vector<8x32xf32>, vector<32x128xf32>, vector<8x128xf32> -> vector<8x128xf32>
    %101 = vector.broadcast %79 : vector<8x1xf32> to vector<8x128xf32>
    %102 = arith.addf %100, %101 : vector<8x128xf32>
    %103 = arith.negf %102 : vector<8x128xf32>
    %104 = math.exp %103 : vector<8x128xf32>
    %cst_71 = arith.constant 1.000000e+00 : f32
    %105 = vector.broadcast %cst_71 : f32 to vector<8x128xf32>
    %106 = arith.addf %105, %104 : vector<8x128xf32>
    %107 = arith.divf %105, %106 : vector<8x128xf32>
    %108 = vector.shape_cast %107 : vector<8x128xf32> to vector<1x8x128xf32>
    %109 = vector.extract_strided_slice %92 {offsets = [0, 0, 0], sizes = [1, 8, 128], strides = [1, 1, 1]} : vector<3x8x128xf32> to vector<1x8x128xf32>
    %110 = vector.shape_cast %109 : vector<1x8x128xf32> to vector<8x128xf32>
    %cst_72 = arith.constant dense<0.000000e+00> : vector<8x128xf32>
    %111 = tpu.matmul %71, %110, %cst_72 {dimension_numbers = #tpu.dot_dimension_numbers<[1], [0], [0], [1], [0, 0, 1, 1], [], []>, precision = #tpu.contract_precision<fp32>} : vector<8x8xf32>, vector<8x128xf32>, vector<8x128xf32> -> vector<8x128xf32>
    %112 = vector.extract_strided_slice %92 {offsets = [1, 0, 0], sizes = [1, 8, 128], strides = [1, 1, 1]} : vector<3x8x128xf32> to vector<1x8x128xf32>
    %113 = vector.shape_cast %112 : vector<1x8x128xf32> to vector<8x128xf32>
    %cst_73 = arith.constant dense<0.000000e+00> : vector<8x128xf32>
    %114 = tpu.matmul %71, %113, %cst_73 {dimension_numbers = #tpu.dot_dimension_numbers<[1], [0], [0], [1], [0, 0, 1, 1], [], []>, precision = #tpu.contract_precision<fp32>} : vector<8x8xf32>, vector<8x128xf32>, vector<8x128xf32> -> vector<8x128xf32>
    %115 = vector.extract_strided_slice %92 {offsets = [2, 0, 0], sizes = [1, 8, 128], strides = [1, 1, 1]} : vector<3x8x128xf32> to vector<1x8x128xf32>
    %116 = vector.shape_cast %115 : vector<1x8x128xf32> to vector<8x128xf32>
    %cst_74 = arith.constant dense<0.000000e+00> : vector<8x128xf32>
    %117 = tpu.matmul %71, %116, %cst_74 {dimension_numbers = #tpu.dot_dimension_numbers<[1], [0], [0], [1], [0, 0, 1, 1], [], []>, precision = #tpu.contract_precision<fp32>} : vector<8x8xf32>, vector<8x128xf32>, vector<8x128xf32> -> vector<8x128xf32>
    %118 = vector.shape_cast %111 : vector<8x128xf32> to vector<1x8x128xf32>
    %119 = vector.shape_cast %114 : vector<8x128xf32> to vector<1x8x128xf32>
    %120 = vector.shape_cast %117 : vector<8x128xf32> to vector<1x8x128xf32>
    %121 = tpu.concatenate %118, %119, %120 in 0 : vector<1x8x128xf32>, vector<1x8x128xf32>, vector<1x8x128xf32> -> vector<3x8x128xf32>
    %122 = vector.broadcast %108 : vector<1x8x128xf32> to vector<3x8x128xf32>
    %123 = arith.mulf %122, %121 : vector<3x8x128xf32>
    %c1_75 = arith.constant 1 : index
    %c0_76 = arith.constant 0 : index
    %c0_77 = arith.constant 0 : index
    %124 = vector.load %arg10[%c1_75, %c0_76, %c0_77] : memref<2x32x128xf32, #tpu.memory_space<vmem>>, vector<1x32x128xf32>
    %125 = vector.shape_cast %124 : vector<1x32x128xf32> to vector<32x128xf32>
    %126 = vector.shape_cast %99 : vector<32x128xf32> to vector<1x32x128xf32>
    tpu.vector_store %arg10[%c1_75, %c0_76, %c0_77], %126 {strides = array<i32>} : memref<2x32x128xf32, #tpu.memory_space<vmem>>, vector<1x32x128xf32>,
    %c1_78 = arith.constant 1 : index
    %c0_79 = arith.constant 0 : index
    %c0_80 = arith.constant 0 : index
    %c0_81 = arith.constant 0 : index
    %127 = vector.load %arg11[%c1_78, %c0_79, %c0_80, %c0_81] : memref<2x3x8x128xf32, #tpu.memory_space<vmem>>, vector<1x3x8x128xf32>
    %128 = vector.shape_cast %127 : vector<1x3x8x128xf32> to vector<3x8x128xf32>
    %129 = vector.shape_cast %123 : vector<3x8x128xf32> to vector<1x3x8x128xf32>
    tpu.vector_store %arg11[%c1_78, %c0_79, %c0_80, %c0_81], %129 {strides = array<i32>} : memref<2x3x8x128xf32, #tpu.memory_space<vmem>>, vector<1x3x8x128xf32>,
    return
  }
  func.func @transform_0(%arg0: i32) -> (i32, i32) {
    %c0_i32 = arith.constant 0 : i32
    %c0_i32_0 = arith.constant 0 : i32
    return %c0_i32, %arg0 : i32, i32
  }
  func.func @transform_1(%arg0: i32) -> (i32, i32, i32) {
    %c0_i32 = arith.constant 0 : i32
    %c0_i32_0 = arith.constant 0 : i32
    %c0_i32_1 = arith.constant 0 : i32
    return %c0_i32, %c0_i32_0, %arg0 : i32, i32, i32
  }
  func.func @transform_2(%arg0: i32) -> (i32, i32, i32) {
    %c0_i32 = arith.constant 0 : i32
    %c0_i32_0 = arith.constant 0 : i32
    %c0_i32_1 = arith.constant 0 : i32
    %c0_i32_2 = arith.constant 0 : i32
    return %c0_i32, %c0_i32_0, %c0_i32_1 : i32, i32, i32
  }
  func.func @transform_3(%arg0: i32) -> (i32, i32, i32) {
    %c0_i32 = arith.constant 0 : i32
    %c0_i32_0 = arith.constant 0 : i32
    %c0_i32_1 = arith.constant 0 : i32
    %c0_i32_2 = arith.constant 0 : i32
    return %c0_i32, %c0_i32_0, %c0_i32_1 : i32, i32, i32
  }
  func.func @transform_4(%arg0: i32) -> (i32, i32, i32) {
    %c0_i32 = arith.constant 0 : i32
    %c0_i32_0 = arith.constant 0 : i32
    %c0_i32_1 = arith.constant 0 : i32
    %c0_i32_2 = arith.constant 0 : i32
    return %c0_i32, %c0_i32_0, %c0_i32_1 : i32, i32, i32
  }
  func.func @transform_5(%arg0: i32) -> (i32, i32, i32) {
    %c0_i32 = arith.constant 0 : i32
    %c0_i32_0 = arith.constant 0 : i32
    %c0_i32_1 = arith.constant 0 : i32
    %c0_i32_2 = arith.constant 0 : i32
    return %c0_i32, %c0_i32_0, %c0_i32_1 : i32, i32, i32
  }
  func.func @transform_6(%arg0: i32) -> (i32, i32, i32) {
    %c0_i32 = arith.constant 0 : i32
    %c0_i32_0 = arith.constant 0 : i32
    %c0_i32_1 = arith.constant 0 : i32
    %c0_i32_2 = arith.constant 0 : i32
    return %c0_i32, %c0_i32_0, %c0_i32_1 : i32, i32, i32
  }
  func.func @transform_7(%arg0: i32) -> (i32, i32, i32) {
    %c0_i32 = arith.constant 0 : i32
    %c0_i32_0 = arith.constant 0 : i32
    %c0_i32_1 = arith.constant 0 : i32
    %c0_i32_2 = arith.constant 0 : i32
    return %c0_i32, %c0_i32_0, %c0_i32_1 : i32, i32, i32
  }
  func.func @transform_8(%arg0: i32) -> (i32, i32, i32) {
    %c0_i32 = arith.constant 0 : i32
    %c0_i32_0 = arith.constant 0 : i32
    %c0_i32_1 = arith.constant 0 : i32
    %c0_i32_2 = arith.constant 0 : i32
    return %c0_i32, %c0_i32_0, %c0_i32_1 : i32, i32, i32
  }
  func.func @transform_9(%arg0: i32) -> (i32, i32, i32) {
    %c0_i32 = arith.constant 0 : i32
    %c0_i32_0 = arith.constant 0 : i32
    %c0_i32_1 = arith.constant 0 : i32
    return %c0_i32, %c0_i32_0, %arg0 : i32, i32, i32
  }
  func.func @transform_10(%arg0: i32) -> (i32, i32, i32, i32) {
    %c0_i32 = arith.constant 0 : i32
    %c0_i32_0 = arith.constant 0 : i32
    %c0_i32_1 = arith.constant 0 : i32
    %c0_i32_2 = arith.constant 0 : i32
    return %c0_i32, %c0_i32_0, %c0_i32_1, %arg0 : i32, i32, i32, i32
  }
}

</mosaic_0001>

<bundles_post_ra>
// kernel: tpu_custom_call.1
= control target key start
LH: loop header
LB: loop body
LE: loop exit
PB: predicated region body
PF: predicated region fallthrough
CT: control target
= control target key end

     0   :  { %s5408_s0 = inlined_call_operand.vmem [shape: f32[32,256], index: 0, kind: input, shape index: {}]   ;;  %s5409_s1 = inlined_call_operand.vmem [shape: f32[3,8,256], index: 1, kind: input, shape index: {}]   ;;  %s5410_s2 = inlined_call_operand.vmem [shape: f32[2,8,8], index: 2, kind: input, shape index: {}]   ;;  %s5411_s3 = inlined_call_operand.vmem [shape: f32[2,8,8], index: 3, kind: input, shape index: {}]   ;;  %s5412_s4 = inlined_call_operand.hbm [shape: f32[2,8,32], index: 4, kind: input, shape index: {}]   ;;  %s5413_s5 = inlined_call_operand.vmem [shape: f32[2,32,8], index: 5, kind: input, shape index: {}]   ;;  %s5414_s6 = inlined_call_operand.vmem [shape: f32[2,32,8], index: 6, kind: input, shape index: {}]   ;;  %s5415_s7 = inlined_call_operand.hbm [shape: f32[2,8,32], index: 7, kind: input, shape index: {}]   ;;  %s5416_s8 = inlined_call_operand.vmem [shape: f32[2,8,1], index: 8, kind: input, shape index: {}]   ;;  %s5417_s9 = inlined_call_operand.hbm [shape: f32[2,32,256], index: 9, kind: output, shape index: {0}]   ;;  %s5418_s10 = inlined_call_operand.hbm [shape: f32[2,3,8,256], index: 10, kind: output, shape index: {1}]  }
   0x1   :  { %5435 = sst [smem:[#allocation30_spill]] %s5408_s0 }
   0x2   :  { %5436 = sst [smem:[#allocation31_spill]] %s5409_s1 }
   0x3   :  { %5437 = sst [smem:[#allocation32_spill]] %s5412_s4 }
   0x4   :  { %16 = vsyncpa [#allocation5], 0 }
   0x5   :  { %17 = vsyncpa [#allocation8], 0 }
   0x6   :  { %18 = vsyncpa [#allocation6], 0 }
   0x7   :  { %20 = vsyncpa [#allocation6 + $0x1], 0 }
   0x8   :  { %21 = vsyncpa [#allocation11], 0 }
   0x9   :  { %23 = vsyncpa [#allocation11 + $0x1], 0  ;;  %s4708_s13 = smov 0   ;;  %s4710_s14 = smov 0  }
   0xa   :  { %s4712_s15 = smov 0   ;;  %s4714_s16 = smov 0  }
   0xb LB: > { %s4729_s17 = sadd.s32 4294967295, %s4643_s16   ;;  %s4356_s18 = sadd.s32 4294967294, %s4643_s16   ;;  %s4643_s16 = sphi %s4714_s16, %s5471_s16   ;;  %s4639_s15 = sphi %s4712_s15, %s5475_s15   ;;  %s4635_s14 = sphi %s4710_s14, %s5474_s14   ;;  %s4631_s13 = sphi %s4708_s13, %s5473_s13  }
   0xc   : > { %s4733_s19 = sadd.s32 1, %s4643_s16   ;;  %s36_s20 = sadd.s32 1, %s4639_s15 }
   0xd   : > { %5438 = sst [smem:[#allocation16_spill]] %s4733_s19  ;;  %s33_s21 = ssub.s32 %s4643_s16, %s4733_s19 }
   0xe   : > { %p43_p0 = scmp.ne.s32.totalorder %s4639_s15, %s4635_s14  ;;  %p34_p1 = scmp.eq.s32.totalorder %s33_s21, 0 }
   0xf   : > { %p44_p2 = scmp.eq.s32.totalorder %s4643_s16, 0  ;;  %p246_p3 = scmp.eq.s32.totalorder %s4729_s17, 1 }
  0x10   : > { %p251_p4 = scmp.ne.s32.totalorder %s4635_s14, %s4631_s13  ;;  %p252_p7 = scmp.eq.s32.totalorder %s4356_s18, 1 }
  0x11   : > { %s4745_s22 = scalar_select %p34_p1, %s4639_s15, %s36_s20  }
  0x12   : > { %p4747_p5 = por %p44_p2, %p43_p0  ;;  %p4751_p6 = por %p246_p3, %p43_p0 }
  0x13   : > { %5439 = sst [smem:[#allocation17_spill]] %s4745_s22  ;;  %p4357_p8 = scmp.ge.s32.totalorder %s4643_s16, 1 }
  0x14   : > { %p285_p9 = scmp.lt.s32.totalorder %s4643_s16, 3  ;;  %p4757_p10 = por %p252_p7, %p251_p4 }
  0x15   : > { %p4423_p11 = scmp.eq.s32.totalorder %s4729_s17, 0  ;;  %s5444_s4 = sld [smem:[#allocation32_spill]] }
  0x16   : > { %p4762_p12 = pnand %p4357_p8, %p285_p9  ;;  %s4645_s30 = smov [#allocation4]  }
  0x17   : > { %s304_s11 = sshll.u32 %s4645_s30, 4  ;;  %s322_s20 = sshll.u32 %s5415_s7, 4  ;;  %s305_s11 = int_to_ptr.vmem [resolvable:$true] %s304_s11  ;;  %s323_s20 = int_to_ptr.hbm [resolvable:$true] %s322_s20 }
  0x18   : > { %p4409_p13 = pneg %p4762_p12  ;;  %s4646_s21 = smov 128  }
  0x19   : > { %s4647_s22 = smov 8   ;;  %s4648_s19 = smov [#allocation7]  }
  0x1a   : > { %p4410_p0 = pnand %p4423_p11, %p4409_p13  ;;  %s324_s27 = sshll.u32 %s4648_s19, 4  ;;  %s325_s27 = int_to_ptr.vmem [resolvable:$true] %s324_s27 }
  0x1b   : > { %s302_s29 = sshll.u32 %s5444_s4, 4  ;;  %p4360_p1 = scmp.ge.s32.totalorder %s4643_s16, 2  ;;  %s303_s29 = int_to_ptr.hbm [resolvable:$true] %s302_s29 }
  0x1c   : > { %4412 = dma.hbm_to_vmem [thread:$0]  (!%p4410_p0), %s303_s29, 256, %s305_s11, [#allocation5], %s4646_s21, %s4646_s21, %s4647_s22  }
  0x1d   : > { %4415 = dma.hbm_to_vmem [thread:$0]  (!%p4410_p0), %s323_s20, 256, %s325_s27, [#allocation8], %s4646_s21, %s4646_s21, %s4647_s22  }
  0x1e   : > { %337 = sbr.rel (%p4360_p1) target bundleno = 62 (0x3e), region = 44 }
  0x23   : > { %340 = sbr.rel (!%p4747_p5) target bundleno = 49 (0x31), region = 48  ;;  %s342_s28 = sand.u32 (%p4747_p5), 1, %s4639_s15  }
  0x24   : > { %s4362_s30 = sshll.u32 (%p4747_p5), %s4643_s16, 3  ;;  %s4361_s12 = sshll.u32 (%p4747_p5), %s342_s28, 5 }
  0x25   : > { %s5445_s0 = sld [smem:[#allocation30_spill]] (%p4747_p5)  ;;  %s344_s19 = scalar_lea.vmem (%p4747_p5), [#allocation2], %s4361_s12 }
  0x2b   : > { %s346_s29 = scalar_lea.vmem %s5445_s0, %s4362_s30 }
  0x2c   : > { %v381_v0 = vld [vmem:[%s346_s29] sm:$0xff]  ;;  %v383_v1 = vld [vmem:[%s346_s29 + $0x10] sm:$0xff] }
  0x2d   : > { %v385_v2 = vld [vmem:[%s346_s29 + $0x20] sm:$0xff]  ;;  %382 = vst [vmem:[%s344_s19] sm:$0xff] %v381_v0  ;;  %v387_v3 = vld [vmem:[%s346_s29 + $0x30] sm:$0xff] }
  0x2e   : > { %384 = vst [vmem:[%s344_s19 + $0x8] sm:$0xff] %v383_v1 }
  0x2f   : > { %386 = vst [vmem:[%s344_s19 + $0x10] sm:$0xff] %v385_v2 }
  0x30   : > { %388 = vst [vmem:[%s344_s19 + $0x18] sm:$0xff] %v387_v3 }
  0x31 PF: > { %394 = sbr.rel (!%p4747_p5) target bundleno = 62 (0x3e), region = 86  ;;  %s396_s22 = sand.u32 (%p4747_p5), 1, %s4639_s15  }
  0x32   : > { %s4363_s11 = sshll.u32 (%p4747_p5), %s4643_s16, 3  ;;  %s4394_s20 = smul.u32 (%p4747_p5), 24, %s396_s22 }
  0x33   : > { %s5446_s1 = sld [smem:[#allocation31_spill]] (%p4747_p5) }
  0x34   : > { %s398_s28 = scalar_lea.vmem (%p4747_p5), [#allocation3], %s4394_s20 }
  0x39   : > { %s400_s27 = scalar_lea.vmem %s5446_s1, %s4363_s11 }
  0x3a   : > { %v433_v4 = vld [vmem:[%s400_s27] sm:$0xff]  ;;  %v435_v5 = vld [vmem:[%s400_s27 + $0x10] sm:$0xff] }
  0x3b   : > { %v437_v6 = vld [vmem:[%s400_s27 + $0x20] sm:$0xff]  ;;  %434 = vst [vmem:[%s398_s28] sm:$0xff] %v433_v4 }
  0x3c   : > { %436 = vst [vmem:[%s398_s28 + $0x8] sm:$0xff] %v435_v5 }
  0x3d   : > { %438 = vst [vmem:[%s398_s28 + $0x10] sm:$0xff] %v437_v6 }
  0x3e PF: > { %447 = sbr.rel (%p4762_p12) target bundleno = 1158 (0x486), region = 124 }
  0x43   : > { %s4796_s23 = sand.u32 1, %s4635_s14  }
  0x44   : > { %s4365_s30 = sshll.u32 %s4796_s23, 5  ;;  %s4395_s12 = smul.u32 24, %s4796_s23 }
  0x45   : > { %s4800_s18 = scalar_lea.vmem [#allocation2], %s4365_s30 }
  0x46   : > { %s459_s29 = scalar_lea.vmem [#allocation3], %s4395_s12 }
  0x47   : > { %4614 = dma.done.wait (%p4423_p11), [#allocation5], 256  }
  0x48   : > { %4616 = vsyncadd (%p4423_p11), [#allocation5], 4294967040 }
  0x49   : > { %4618 = dma.done.wait (%p4423_p11), [#allocation8], 256  }
  0x4a   : > { %4620 = vsyncadd (%p4423_p11), [#allocation8], 4294967040  ;;  %vm533_vm0 = vcmask 64512   ;;  %v517_v7 = vld [vmem:[%s459_s29] sm:$0xff]  ;;  %v518_v9 = vld [vmem:[%s459_s29 + $0x8] sm:$0xff]  ;;  %vm992_vm1 = vcmask 261120  }
  0x4b   : > { %v521_v8 = vld [vmem:[%s5410_s2] sm:$0xff]  ;;  %v4813_v10 = vand.u32 4294901760, %v517_v7  ;;  %v4816_v12 = vand.u32 4294901760, %v518_v9  ;;  %v519_v13 = vld [vmem:[%s459_s29 + $0x10] sm:$0xff]  ;;  %v516_v16 = vld [vmem:[%s4800_s18 + $0x18] sm:$0xff]  ;;  %s4368_s4 = sshll.u32 %s4796_s23, 6 }
  0x4c   : > { %v535_v11 = vsel %vm533_vm0, %v521_v8, 0  ;;  %v4820_v15 = vand.u32 4294901760, %v519_v13  ;;  %v515_v20 = vld [vmem:[%s4800_s18 + $0x10] sm:$0xff]  ;;  %v4845_v24 = vand.u32 4294901760, %v516_v16  ;;  %v514_v25 = vld [vmem:[%s4800_s18 + $0x8] sm:$0xff]  ;;  %v513_v32 = vld [vmem:[%s4800_s18] sm:$0xff] }
  0x4d   : > { %v4818_v14 = vand.u32 4294901760, %v535_v11  ;;  %v4824_v17 = vsub.f32 %v517_v7, %v4813_v10  ;;  %629 = vmatpush.msra.mxu3 %v4813_v10  ;;  %553 = vmatpush.msra.mxu0 %v4813_v10  ;;  %v4829_v18 = vsub.f32 %v518_v9, %v4816_v12  ;;  %v4858_v29 = vand.u32 4294901760, %v515_v20  ;;  %v520_v40 = vld [vmem:[#allocation4] sm:$0xff]  ;;  %s5046_s21 = scalar_lea.vmem [#allocation9], %s4368_s4  ;;  %s4396_s26 = smul.u32 48, %s4796_s23 }
  0x4e   : > { %v4843_v23 = vsub.f32 %v519_v13, %v4820_v15  ;;  %v4864_v31 = vand.u32 4294901760, %v514_v25  ;;  %v4875_v36 = vsub.f32 %v516_v16, %v4845_v24  ;;  %v4884_v39 = vand.u32 4294901760, %v513_v32  ;;  %s4196_s29 = sshll.u32 %s5046_s21, 4  ;;  %s4180_s27 = scalar_lea.sflag [#allocation6], %s4796_s23  ;;  %s4197_s29 = int_to_ptr.vmem [resolvable:$true] %s4196_s29 }
  0x4f   : > { %v4832_v19 = vsub.f32 %v535_v11, %v4818_v14  ;;  %606 = vmatpush.msra.mxu2 %v4824_v17  ;;  %v4837_v21 = vand.u32 4294901760, %v4824_v17  ;;  %v4840_v22 = vand.u32 4294901760, %v4829_v18  ;;  %v4882_v38 = vsub.f32 %v515_v20, %v4858_v29  ;;  %s5189_s19 = scalar_lea.vmem [#allocation10], %s4396_s26  ;;  %s4390_s26 = sshll.u32 %s4729_s17, 3 }
  0x50   : > { %5447 = vst [vmem:[#allocation18_spill] sm:$0xff] %v4864_v31  ;;  %v4872_v35 = vand.u32 4294901760, %v4843_v23  ;;  %v4893_v42 = vand.u32 4294901760, %v4875_v36  ;;  %v4896_v43 = vsub.f32 %v514_v25, %v4864_v31  ;;  %v4906_v45 = vsub.f32 %v513_v32, %v4884_v39  ;;  %s4195_s20 = scalar_lea.hbm %s5417_s9, %s4390_s26 }
  0x51   : > { %609 = vmatmul.f32.vlgmr.msra.gmra.mxu2 %v4832_v19  ;;  %v4850_v26 = vand.u32 4294901760, %v4832_v19  ;;  %v581_v27 = vsub.f32 %v4824_v17, %v4837_v21  ;;  %v727_v28 = vsub.f32 %v4829_v18, %v4840_v22  ;;  %655 = vmatpush.msrb.mxu0 %v4837_v21  ;;  %5448 = vst [vmem:[#allocation19_spill] sm:$0xff] %v4875_v36  ;;  %v4903_v44 = vand.u32 4294901760, %v4882_v38  ;;  %s4198_s4 = sshll.u32 %s4195_s20, 4  ;;  %s4199_s4 = int_to_ptr.hbm [resolvable:$true] %s4198_s4 }
  0x52   : > { %699 = vmatpush.msrb.mxu2 %v4816_v12  ;;  %5449 = vst [vmem:[#allocation20_spill] sm:$0xff] %v4882_v38  ;;  %v873_v41 = vsub.f32 %v4843_v23, %v4872_v35  ;;  %v994_v46 = vsel %vm992_vm1, %v520_v40, 0  ;;  %v1040_v48 = vsub.f32 %v4875_v36, %v4893_v42  ;;  %v4916_v49 = vand.u32 4294901760, %v4896_v43  ;;  %v527_v40 = vld [vmem:[%s5414_s6] sm:$0xff]  ;;  %s4555_s28 = sshra.s32 %s4199_s4, 4  ;;  %s4556_s28 = int_to_ptr.hbm [resolvable:$true] %s4555_s28 }
  0x53   : > { %633 = vmatmul.f32.vlgmr.msra.gmra.mxu3 %v4850_v26  ;;  %v557_v30 = vsub.f32 %v4832_v19, %v4850_v26  ;;  %v4867_v33 = vand.u32 4294901760, %v581_v27  ;;  %v4869_v34 = vand.u32 4294901760, %v727_v28  ;;  %5450 = vst [vmem:[#allocation21_spill] sm:$0xff] %v4884_v39  ;;  %v1016_v50 = vand.u32 4294901760, %v994_v46  ;;  %s4557_s30 = scalar_lea.hbm %s4556_s28, 64  ;;  %p4562_p5 = scmp.lt.s32.totalorder %s4556_s28, %s5417_s9 }
  0x54   : > { %801 = vmatpush.msra.mxu2 %v4840_v22  ;;  %5451 = vst [vmem:[#allocation22_spill] sm:$0xff] %v4893_v42  ;;  %v4911_v47 = vand.u32 4294901760, %v873_v41  ;;  %v1046_v51 = vsub.f32 %v4882_v38, %v4903_v44  ;;  %v4921_v52 = vand.u32 4294901760, %v4906_v45  ;;  %v4927_v53 = vand.u32 4294901760, %v1040_v48  ;;  %p4558_p2 = scmp.ne.s32.totalorder %s4556_s28, %s4557_s30 }
  0x55   : > { %v4877_v37 = vand.u32 4294901760, %v557_v30  ;;  %583 = vmatpush.msra.mxu1 %v4867_v33  ;;  %729 = vmatpush.msrb.mxu3 %v4869_v34  ;;  %5452 = vst [vmem:[#allocation23_spill] sm:$0xff] %v4896_v43  ;;  %v1052_v54 = vsub.f32 %v4896_v43, %v4916_v49  ;;  %v1017_v55 = vsub.f32 %v994_v46, %v1016_v50 }
  0x56   : > { %585 = vmatmul.f32.vlgmr.msra.gmra.mxu1 %v4818_v14  ;;  %5453 = vst [vmem:[#allocation24_spill] sm:$0xff] %v4903_v44  ;;  %v4933_v56 = vand.u32 4294901760, %v1046_v51  ;;  %v1058_v57 = vsub.f32 %v4906_v45, %v4921_v52  ;;  %p4559_p3 = pnand %p4558_p2, %p4751_p6 }
  0x57   : > { %559 = vmatmul.f32.vlgmr.msra.gmra.mxu0 %v4877_v37  ;;  %677 = vmatpush.msrb.mxu1 %v4813_v10  ;;  %5454 = vst [vmem:[#allocation25_spill] sm:$0xff] %v4906_v45  ;;  %v4940_v58 = vand.u32 4294901760, %v1052_v54  ;;  %v1018_v59 = vand.u32 4294901760, %v1017_v55 }
  0x58   : > { %823 = vmatpush.msra.mxu3 %v4816_v12  ;;  %752 = vmatpush.msra.mxu0 %v4829_v18  ;;  %5455 = vst [vmem:[#allocation26_spill] sm:$0xff] %v4916_v49  ;;  %v4944_v60 = vand.u32 4294901760, %v1058_v57  ;;  %p4560_p4 = pneg %p4559_p3 }
  0x59   : > { %705 = vmatmul.f32.vlgmr.msrb.gmra.mxu2 %v4877_v37  ;;  %775 = vmatpush.msra.mxu1 %v4816_v12  ;;  %5456 = vst [vmem:[#allocation27_spill] sm:$0xff] %v4921_v52  ;;  %v1019_v61 = vsub.f32 %v1017_v55, %v1018_v59 }
  0x5a   : > { %898 = vmatpush.msrb.mxu2 %v4843_v23  ;;  %5457 = vst [vmem:[#allocation28_spill] sm:$0xff] %v4940_v58 }
  0x5b   : > { %731 = vmatmul.f32.vlgmr.msrb.gmra.mxu3 %v4818_v14  ;;  %5458 = vst [vmem:[#allocation29_spill] sm:$0xff] %v4944_v60  ;;  %v1020_v62 = vand.u32 4294901760, %v1019_v61 }
  0x5c   : > { %921 = vmatpush.msrb.mxu3 %v4820_v15 }
  0x5e   : > { %679 = vmatmul.f32.vlgmr.msrb.gmra.mxu1 %v4818_v14 }
  0x5f   : > { %657 = vmatmul.f32.vlgmr.msrb.gmra.mxu0 %v4818_v14  ;;  %875 = vmatpush.msrb.mxu1 %v4911_v47 }
  0x60   : > { %845 = vmatpush.msrb.mxu0 %v4820_v15 }
  0x61   : > { %803 = vmatmul.f32.vlgmr.msra.gmra.mxu2 %v4818_v14 }
  0x62   : > { %1009 = vmatpush.msra.mxu2 %v4845_v24 }
  0x63   : > { %825 = vmatmul.f32.vlgmr.msra.gmra.mxu3 %v4818_v14 }
  0x64   : > { %1042 = vmatpush.msra.mxu3 %v4927_v53  ;;  %1011 = vmatpush.msra.mxu2 %v4858_v29 }
  0x66   : > { %1048 = vmatpush.msra.mxu3 %v4933_v56  ;;  %1013 = vmatpush.msra.mxu2 %v4864_v31 }
  0x67   : > { %755 = vmatmul.f32.vlgmr.msra.gmra.mxu0 %v4832_v19  ;;  %779 = vmatmul.f32.vlgmr.msra.gmra.mxu1 %v4850_v26 }
  0x68   : > { %1054 = vmatpush.msra.mxu3 %v4940_v58  ;;  %1015 = vmatpush.msra.mxu2 %v4884_v39 }
  0x69   : > { %901 = vmatmul.f32.vlgmr.msrb.gmra.mxu2 %v4832_v19  ;;  %947 = vmatpush.msra.mxu0 %v4872_v35 }
  0x6a   : > { %1060 = vmatpush.msra.mxu3 %v4944_v60  ;;  %1138 = vmatpush.msrb.mxu2 %v4893_v42 }
  0x6b   : > { %925 = vmatmul.f32.vlgmr.msrb.gmra.mxu3 %v4850_v26  ;;  %969 = vmatpush.msra.mxu1 %v4820_v15 }
  0x6c   : > { %1142 = vmatpush.msrb.mxu2 %v4903_v44  ;;  %1169 = vmatpush.msrb.mxu3 %v4845_v24 }
  0x6e   : > { %1146 = vmatpush.msrb.mxu2 %v4916_v49  ;;  %1171 = vmatpush.msrb.mxu3 %v4858_v29 }
  0x6f   : > { %851 = vmatmul.f32.vlgmr.msrb.gmra.mxu0 %v4877_v37  ;;  %877 = vmatmul.f32.vlgmr.msrb.gmra.mxu1 %v4818_v14 }
  0x70   : > { %1080 = vmatpush.msrb.mxu0 %v4875_v36  ;;  %1109 = vmatpush.msrb.mxu1 %v4845_v24 }
  0x71   : > { %1021 = vmatmul.f32.vlgmr.msra.gmra.mxu2 %v1020_v62  ;;  %1173 = vmatpush.msrb.mxu3 %v4864_v31 }
  0x72   : > { %1083 = vmatpush.msrb.mxu0 %v4882_v38  ;;  %1111 = vmatpush.msrb.mxu1 %v4858_v29 }
  0x73   : > { %1062 = vmatmul.f32.vlgmr.msra.gmra.mxu3 %v1016_v50  ;;  %1150 = vmatpush.msrb.mxu2 %v4921_v52 }
  0x74   : > { %1086 = vmatpush.msrb.mxu0 %v4896_v43  ;;  %1113 = vmatpush.msrb.mxu1 %v4864_v31 }
  0x75   : > { %1175 = vmatpush.msrb.mxu3 %v4884_v39 }
  0x76   : > { %1089 = vmatpush.msrb.mxu0 %v4906_v45  ;;  %1115 = vmatpush.msrb.mxu1 %v4884_v39 }
  0x77   : > { %949 = vmatmul.f32.vlgmr.msra.gmra.mxu0 %v4818_v14  ;;  %971 = vmatmul.f32.vlgmr.msra.gmra.mxu1 %v4818_v14 }
  0x79   : > { %1152 = vmatmul.f32.vlgmr.msrb.gmra.mxu2 %v1016_v50 }
  0x7b   : > { %1177 = vmatmul.f32.vlgmr.msrb.gmra.mxu3 %v1016_v50  ;;  %v1182_v50 = vsel %vm533_vm0, %v527_v40, 0 }
  0x7f   : > { %1092 = vmatmul.f32.vlgmr.msrb.gmra.mxu0 %v1017_v55  ;;  %1119 = vmatmul.f32.vlgmr.msrb.gmra.mxu1 %v1018_v59  ;;  %v4983_v59 = vand.u32 4294901760, %v1182_v50 }
  0xd3   : > { %v586_v0 = vpop.f32.mrf.mxu1 }
  0xd4   : > { %v560_v63 = vpop.f32.mrf.mxu0  ;;  %v610_v1 = vpop.f32.mrf.mxu2 }
  0xd5   : > { %v587_v11 = vadd.f32 %v586_v0, %v560_v63  ;;  %v528_v0 = vld [vmem:[%s5414_s6 + $0x8] sm:$0xff] }
  0xd6   : > { %v634_v2 = vpop.f32.mrf.mxu3 }
  0xd7   : > { %v611_v14 = vadd.f32 %v610_v1, %v587_v11 }
  0xd9   : > { %v635_v27 = vadd.f32 %v634_v2, %v611_v14 }
  0xdb   : > { %v680_v4 = vpop.f32.mrf.mxu1 }
  0xdc   : > { %v658_v3 = vpop.f32.mrf.mxu0  ;;  %v706_v5 = vpop.f32.mrf.mxu2 }
  0xdd   : > { %v659_v41 = vadd.f32 %v658_v3, %v635_v27 }
  0xde   : > { %v732_v6 = vpop.f32.mrf.mxu3 }
  0xdf   : > { %v733_v7 = vadd.f32 %v732_v6, %v706_v5  ;;  %v4981_v51 = vadd.f32 %v680_v4, %v659_v41  ;;  %v1211_v4 = vsub.f32 %v1182_v50, %v4983_v59 }
  0xe1   : > { %v975_v1 = vmul.f32 %v4981_v51, %v4981_v51 }
  0xe4   : > { %v756_v8 = vpop.f32.mrf.mxu0  ;;  %v780_v9 = vpop.f32.mrf.mxu1 }
  0xe5   : > { %v757_v13 = vadd.f32 %v756_v8, %v733_v7  ;;  %v804_v16 = vpop.f32.mrf.mxu2  ;;  %v1185_v7 = vsel %vm533_vm0, %v528_v0, 0 }
  0xe6   : > { %v826_v19 = vpop.f32.mrf.mxu3 }
  0xe7   : > { %v781_v20 = vadd.f32 %v780_v9, %v757_v13 }
  0xe9   : > { %v805_v28 = vadd.f32 %v804_v16, %v781_v20  ;;  %v1212_v16 = vand.u32 4294901760, %v1211_v4 }
  0xeb   : > { %v4978_v48 = vadd.f32 %v826_v19, %v805_v28  ;;  %v4998_v19 = vand.u32 4294901760, %v1185_v7  ;;  %v1213_v28 = vsub.f32 %v1211_v4, %v1212_v16 }
  0xec   : > { %v852_v25 = vpop.f32.mrf.mxu0  ;;  %v878_v26 = vpop.f32.mrf.mxu1 }
  0xed   : > { %v879_v30 = vadd.f32 %v878_v26, %v852_v25  ;;  %v902_v32 = vpop.f32.mrf.mxu2  ;;  %v976_v61 = vmul.f32 %v4978_v48, %v4978_v48  ;;  %v529_v25 = vld [vmem:[%s5414_s6 + $0x10] sm:$0xff] }
  0xee   : > { %v926_v37 = vpop.f32.mrf.mxu3 }
  0xef   : > { %v903_v46 = vadd.f32 %v902_v32, %v879_v30  ;;  %v978_v5 = vadd.f32 %v976_v61, %v975_v1  ;;  %v1219_v30 = vsub.f32 %v1185_v7, %v4998_v19 }
  0xf1   : > { %v927_v54 = vadd.f32 %v926_v37, %v903_v46  ;;  %v1188_v37 = vsel %vm533_vm0, %v529_v25, 0  ;;  %v1214_v46 = vand.u32 4294901760, %v1213_v28  ;;  %v1220_v50 = vand.u32 4294901760, %v1219_v30 }
  0xf3   : > { %v1221_v0 = vsub.f32 %v1219_v30, %v1220_v50 }
  0xf4   : > { %v950_v55 = vpop.f32.mrf.mxu0  ;;  %v972_v57 = vpop.f32.mrf.mxu1 }
  0xf5   : > { %v951_v62 = vadd.f32 %v950_v55, %v927_v54  ;;  %v1022_v63 = vpop.f32.mrf.mxu2  ;;  %v5005_v55 = vand.u32 4294901760, %v1188_v37 }
  0xf6   : > { %v1063_v3 = vpop.f32.mrf.mxu3 }
  0xf7   : > { %v4992_v2 = vadd.f32 %v972_v57, %v951_v62  ;;  %v1064_v9 = vadd.f32 %v1063_v3, %v1022_v63  ;;  %v530_v62 = vld [vmem:[%s5414_s6 + $0x18] sm:$0xff]  ;;  %v1227_v3 = vsub.f32 %v1188_v37, %v5005_v55 }
  0xf9   : > { %v977_v6 = vmul.f32 %v4992_v2, %v4992_v2 }
  0xfb   : > { %v979_v8 = vadd.f32 %v978_v5, %v977_v6  ;;  %v1191_v6 = vsel %vm533_vm0, %v530_v62, 0 }
  0xfc   : > { %v1093_v11 = vpop.f32.mrf.mxu0  ;;  %v1120_v13 = vpop.f32.mrf.mxu1 }
  0xfd   : > { %4469 = vrsqrt.f32 %v979_v8  ;;  %v1094_v14 = vadd.f32 %v1093_v11, %v1064_v9  ;;  %v1153_v20 = vpop.f32.mrf.mxu2  ;;  %v1222_v11 = vand.u32 4294901760, %v1221_v0  ;;  %vm987_vm2 = vcmp.eq.f32.partialorder %v979_v8, inf }
  0xfe   : > { %v1178_v27 = vpop.f32.mrf.mxu3  ;;  %vm989_vm3 = vcmp.eq.f32.partialorder %v979_v8, 0.0 }
  0xff   : > { %v1121_v26 = vadd.f32 %v1120_v13, %v1094_v14  ;;  %v1228_v14 = vand.u32 4294901760, %v1227_v3 }
 0x101   : > { %v1154_v32 = vadd.f32 %v1153_v20, %v1121_v26  ;;  %v5012_v20 = vand.u32 4294901760, %v1191_v6  ;;  %v1229_v28 = vsub.f32 %v1227_v3, %v1228_v14 }
 0x103   : > { %v4470_v40 = vpop.eup %4469  ;;  %v1179_v41 = vadd.f32 %v1178_v27, %v1154_v32  ;;  %v523_v32 = vld [vmem:[%s5413_s5] sm:$0xff] }
 0x104   : > { %v981_v54 = vmul.f32 %v4470_v40, %v979_v8 }
 0x105   : > { %v1208_v57 = vand.u32 4294901760, %v1179_v41 }
 0x106   : > { %v982_v61 = vmul.f32 %v4470_v40, %v981_v54  ;;  %v1230_v54 = vand.u32 4294901760, %v1229_v28 }
 0x107   : > { %v1259_v63 = vsub.f32 %v1179_v41, %v1208_v57  ;;  %1209 = vmatpush.msra.mxu0 %v1208_v57  ;;  %1336 = vmatpush.msra.mxu3 %v1208_v57  ;;  %v1433_v41 = vsel %vm533_vm0, %v523_v32, 0 }
 0x108   : > { %1215 = vmatmul.f32.vlgmr.msra.gmra.mxu0 %v1214_v46  ;;  %1340 = vmatmul.f32.vlgmr.msra.gmra.mxu3 %v1212_v16  ;;  %v983_v1 = vmul.f32 0.5, %v982_v61  ;;  %v990_v16 = vand.u32 2147483648, %v979_v8  ;;  %v1461_v62 = vand.u32 4294901760, %v1433_v41 }
 0x109   : > { %1298 = vmatpush.msra.mxu2 %v1259_v63  ;;  %v1260_v5 = vand.u32 4294901760, %v1259_v63 }
 0x10a   : > { %1301 = vmatmul.f32.vlgmr.msra.gmra.mxu2 %v1211_v4  ;;  %v984_v7 = vsub.f32 1.5, %v983_v1  ;;  %v1235_v4 = vsub.f32 %v1191_v6, %v5012_v20 }
 0x10b   : > { %1380 = vmatpush.msrb.mxu0 %v1260_v5  ;;  %v1261_v9 = vsub.f32 %v1259_v63, %v1260_v5 }
 0x10c   : > { %v985_v13 = vmul.f32 %v4470_v40, %v984_v7  ;;  %v1236_v61 = vand.u32 4294901760, %v1235_v4 }
 0x10d   : > { %v1262_v25 = vand.u32 4294901760, %v1261_v9  ;;  %v525_v9 = vld [vmem:[%s5413_s5 + $0x10] sm:$0xff] }
 0x10e   : > { %v986_v26 = vmul.f32 %v985_v13, %v979_v8  ;;  %v1237_v0 = vsub.f32 %v1235_v4, %v1236_v61  ;;  %v1439_v13 = vsel %vm533_vm0, %v525_v9, 0 }
 0x10f   : > { %1263 = vmatpush.msra.mxu1 %v1262_v25 }
 0x110   : > { %1223 = vmatmul.f32.gmra.mxu0 %v1222_v11  ;;  %1265 = vmatmul.f32.vlgmr.msra.gmra.mxu1 %v4983_v59  ;;  %v988_v27 = vsel %vm987_vm2, %v979_v8, %v986_v26  ;;  %v1238_v5 = vand.u32 4294901760, %v1237_v0  ;;  %v1477_v26 = vand.u32 4294901760, %v1439_v13 }
 0x111   : > { %1414 = vmatpush.msrb.mxu1 %v1208_v57  ;;  %v991_v37 = vsel %vm989_vm3, %v990_v16, %v988_v27  ;;  %1346 = vmatmul.f32.gmra.mxu3 %v1220_v50  ;;  %v1462_v57 = vsub.f32 %v1433_v41, %v1461_v62  ;;  %v526_v16 = vld [vmem:[%s5413_s5 + $0x18] sm:$0xff] }
 0x112   : > { %1306 = vmatmul.f32.gmra.mxu2 %v1219_v30  ;;  %v1459_v40 = vand.u32 4294901760, %v991_v37  ;;  %v524_v30 = vld [vmem:[%s5413_s5 + $0x8] sm:$0xff]  ;;  %v1478_v28 = vsub.f32 %v1439_v13, %v1477_v26 }
 0x113   : > { %v1436_v1 = vsel %vm533_vm0, %v524_v30, 0  ;;  %v1463_v6 = vand.u32 4294901760, %v1462_v57 }
 0x114   : > { %1460 = vmatpush.msrb.mxu2 %v1459_v40  ;;  %1587 = vmatpush.msra.mxu1 %v1459_v40  ;;  %v1510_v46 = vsub.f32 %v991_v37, %v1459_v40  ;;  %v1469_v7 = vand.u32 4294901760, %v1436_v1  ;;  %v1479_v37 = vand.u32 4294901760, %v1478_v28 }
 0x115   : > { %v1464_v11 = vsub.f32 %v1462_v57, %v1463_v6 }
 0x116   : > { %1549 = vmatpush.msra.mxu0 %v1510_v46  ;;  %v1511_v8 = vand.u32 4294901760, %v1510_v46  ;;  %v1480_v41 = vsub.f32 %v1478_v28, %v1479_v37 }
 0x118   : > { %1231 = vmatmul.f32.gmra.mxu0 %v1230_v54  ;;  %1269 = vmatmul.f32.gmra.mxu1 %v4998_v19  ;;  %v1512_v63 = vsub.f32 %v1510_v46, %v1511_v8  ;;  %v1481_v54 = vand.u32 4294901760, %v1480_v41 }
 0x119   : > { %1631 = vmatpush.msra.mxu2 %v1511_v8  ;;  %1352 = vmatmul.f32.gmra.mxu3 %v1228_v14  ;;  %v1465_v14 = vand.u32 4294901760, %v1464_v11 }
 0x11a   : > { %1311 = vmatmul.f32.gmra.mxu2 %v1227_v3  ;;  %v1513_v50 = vand.u32 4294901760, %v1512_v63  ;;  %v1470_v3 = vsub.f32 %v1436_v1, %v1469_v7 }
 0x11c   : > { %1514 = vmatpush.msrb.mxu3 %v1513_v50  ;;  %v1471_v25 = vand.u32 4294901760, %v1470_v3 }
 0x11e   : > { %1665 = vmatpush.msra.mxu3 %v1459_v40  ;;  %v1472_v27 = vsub.f32 %v1470_v3, %v1471_v25 }
 0x120   : > { %1239 = vmatmul.f32.gmra.mxu0 %v1238_v5  ;;  %1273 = vmatmul.f32.gmra.mxu1 %v5005_v55  ;;  %v1473_v32 = vand.u32 4294901760, %v1472_v27 }
 0x121   : > { %1358 = vmatmul.f32.gmra.mxu3 %v1236_v61 }
 0x122   : > { %1316 = vmatmul.f32.gmra.mxu2 %v1235_v4  ;;  %v1442_v4 = vsel %vm533_vm0, %v526_v16, 0 }
 0x123   : > { %v1485_v40 = vand.u32 4294901760, %v1442_v4 }
 0x125   : > { %v1486_v46 = vsub.f32 %v1442_v4, %v1485_v40 }
 0x127   : > { %v1487_v61 = vand.u32 4294901760, %v1486_v46 }
 0x128   : > { %1277 = vmatmul.f32.gmra.mxu1 %v5012_v20  ;;  %1382 = vmatmul.f32.vlgmr.msrb.gmra.mxu0 %v4983_v59 }
 0x129   : > { %1516 = vmatmul.f32.vlgmr.msrb.gmra.mxu3 %v1461_v62  ;;  %v1488_v8 = vsub.f32 %v1486_v46, %v1487_v61 }
 0x12a   : > { %1466 = vmatmul.f32.vlgmr.msrb.gmra.mxu2 %v1465_v14 }
 0x12b   : > { %v1489_v63 = vand.u32 4294901760, %v1488_v8 }
 0x130   : > { %1386 = vmatmul.f32.gmra.mxu0 %v4998_v19  ;;  %1416 = vmatmul.f32.vlgmr.msrb.gmra.mxu1 %v4983_v59 }
 0x131   : > { %1520 = vmatmul.f32.gmra.mxu3 %v1469_v7 }
 0x132   : > { %1474 = vmatmul.f32.gmra.mxu2 %v1473_v32 }
 0x138   : > { %1390 = vmatmul.f32.gmra.mxu0 %v5005_v55  ;;  %1420 = vmatmul.f32.gmra.mxu1 %v4998_v19 }
 0x139   : > { %1524 = vmatmul.f32.gmra.mxu3 %v1477_v26 }
 0x13a   : > { %1482 = vmatmul.f32.gmra.mxu2 %v1481_v54 }
 0x140   : > { %1394 = vmatmul.f32.gmra.mxu0 %v5012_v20  ;;  %1424 = vmatmul.f32.gmra.mxu1 %v5005_v55 }
 0x141   : > { %1528 = vmatmul.f32.gmra.mxu3 %v1485_v40 }
 0x142   : > { %1490 = vmatmul.f32.gmra.mxu2 %v1489_v63 }
 0x148   : > { %1428 = vmatmul.f32.gmra.mxu1 %v5012_v20  ;;  %1552 = vmatmul.f32.vlgmr.msra.gmra.mxu0 %v1462_v57 }
 0x149   : > { %1667 = vmatmul.f32.vlgmr.msra.gmra.mxu3 %v1461_v62 }
 0x14a   : > { %1633 = vmatmul.f32.vlgmr.msra.gmra.mxu2 %v1461_v62 }
 0x150   : > { %1557 = vmatmul.f32.gmra.mxu0 %v1470_v3  ;;  %1591 = vmatmul.f32.vlgmr.msra.gmra.mxu1 %v1463_v6 }
 0x151   : > { %1671 = vmatmul.f32.gmra.mxu3 %v1469_v7 }
 0x152   : > { %1637 = vmatmul.f32.gmra.mxu2 %v1469_v7 }
 0x158   : > { %1562 = vmatmul.f32.gmra.mxu0 %v1478_v28  ;;  %1597 = vmatmul.f32.gmra.mxu1 %v1471_v25 }
 0x159   : > { %1675 = vmatmul.f32.gmra.mxu3 %v1477_v26 }
 0x15a   : > { %1641 = vmatmul.f32.gmra.mxu2 %v1477_v26 }
 0x160   : > { %1567 = vmatmul.f32.gmra.mxu0 %v1486_v46  ;;  %1603 = vmatmul.f32.gmra.mxu1 %v1479_v37 }
 0x161   : > { %1679 = vmatmul.f32.gmra.mxu3 %v1485_v40 }
 0x162   : > { %1645 = vmatmul.f32.gmra.mxu2 %v1485_v40 }
 0x168   : > { %1609 = vmatmul.f32.gmra.mxu1 %v1487_v61 }
 0x185   : > { %v1216_v59 = vpop.f32.mrf.mxu0 }
 0x18b   : > { %v1341_v19 = vpop.f32.mrf.mxu3 }
 0x18d   : > { %v1224_v55 = vpop.f32.mrf.mxu0  ;;  %v1266_v20 = vpop.f32.mrf.mxu1 }
 0x18e   : > { %v1302_v0 = vpop.f32.mrf.mxu2  ;;  %v1267_v32 = vadd.f32 %v1266_v20, %v1216_v59 }
 0x190   : > { %v1303_v40 = vadd.f32 %v1302_v0, %v1267_v32 }
 0x192   : > { %v1342_v61 = vadd.f32 %v1341_v19, %v1303_v40 }
 0x194   : > { %v1347_v30 = vpop.f32.mrf.mxu3 }
 0x195   : > { %v1232_v62 = vpop.f32.mrf.mxu0  ;;  %v1270_v50 = vpop.f32.mrf.mxu1 }
 0x196   : > { %v1307_v57 = vpop.f32.mrf.mxu2  ;;  %v1271_v8 = vadd.f32 %v1270_v50, %v1224_v55 }
 0x198   : > { %v1308_v45 = vadd.f32 %v1307_v57, %v1271_v8 }
 0x19a   : > { %v1348_v42 = vadd.f32 %v1347_v30, %v1308_v45 }
 0x19c   : > { %v1353_v1 = vpop.f32.mrf.mxu3 }
 0x19d   : > { %v1240_v5 = vpop.f32.mrf.mxu0  ;;  %v1274_v6 = vpop.f32.mrf.mxu1 }
 0x19e   : > { %v1312_v7 = vpop.f32.mrf.mxu2  ;;  %v1275_v36 = vadd.f32 %v1274_v6, %v1232_v62 }
 0x1a0   : > { %v1313_v20 = vadd.f32 %v1312_v7, %v1275_v36 }
 0x1a2   : > { %v1354_v50 = vadd.f32 %v1353_v1, %v1313_v20 }
 0x1a4   : > { %v1359_v9 = vpop.f32.mrf.mxu3 }
 0x1a5   : > { %v1278_v11 = vpop.f32.mrf.mxu1  ;;  %v1383_v3 = vpop.f32.mrf.mxu0 }
 0x1a6   : > { %v1317_v13 = vpop.f32.mrf.mxu2  ;;  %v1384_v52 = vadd.f32 %v1383_v3, %v1342_v61  ;;  %v1279_v3 = vadd.f32 %v1278_v11, %v1240_v5 }
 0x1a8   : > { %v1318_v30 = vadd.f32 %v1317_v13, %v1279_v3 }
 0x1ac   : > { %v1517_v14 = vpop.f32.mrf.mxu3 }
 0x1ad   : > { %v1387_v25 = vpop.f32.mrf.mxu0  ;;  %v1417_v26 = vpop.f32.mrf.mxu1 }
 0x1ae   : > { %v1467_v16 = vpop.f32.mrf.mxu2  ;;  %v1418_v49 = vadd.f32 %v1417_v26, %v1384_v52  ;;  %v1388_v59 = vadd.f32 %v1387_v25, %v1348_v42 }
 0x1b0   : > { %v1468_v60 = vadd.f32 %v1467_v16, %v1418_v49  ;;  %v531_v16 = vld [vmem:[#allocation7] sm:$0xff] }
 0x1b2   : > { %v1518_v0 = vadd.f32 %v1517_v14, %v1468_v60  ;;  %v1360_v60 = vadd.f32 %v1359_v9, %v1318_v30  ;;  %v1689_v9 = vsel %vm992_vm1, %v531_v16, 0  ;;  %v532_v30 = vld [vmem:[%s5416_s8] sm:$0xff] }
 0x1b4   : > { %v1521_v27 = vpop.f32.mrf.mxu3 }
 0x1b5   : > { %v1391_v28 = vpop.f32.mrf.mxu0  ;;  %v1421_v4 = vpop.f32.mrf.mxu1 }
 0x1b6   : > { %v1475_v37 = vpop.f32.mrf.mxu2  ;;  %v1422_v32 = vadd.f32 %v1421_v4, %v1388_v59  ;;  %v1392_v40 = vadd.f32 %v1391_v28, %v1354_v50  ;;  %v5052_v59 = vand.u32 4294901760, %v1689_v9 }
 0x1b8   : > { %v1476_v57 = vadd.f32 %v1475_v37, %v1422_v32  ;;  %v1712_v32 = vsub.f32 %v1689_v9, %v5052_v59  ;;  %v2205_v9 = vand.u32 4294901760, %v4992_v2 }
 0x1ba   : > { %v1522_v62 = vadd.f32 %v1521_v27, %v1476_v57  ;;  %v4649_v57 = vmov 0  }
 0x1bb   : > { %4468 = vset.pattern.permute.xlu0 %v4649_v57 }
 0x1bc   : > { %v1525_v41 = vpop.f32.mrf.mxu3  ;;  %1685 = vperm.xlu0 %4468, %v532_v30  }
 0x1bd   : > { %v1395_v46 = vpop.f32.mrf.mxu0  ;;  %v1425_v54 = vpop.f32.mrf.mxu1 }
 0x1be   : > { %v1483_v63 = vpop.f32.mrf.mxu2  ;;  %v1426_v49 = vadd.f32 %v1425_v54, %v1392_v40  ;;  %v1396_v11 = vadd.f32 %v1395_v46, %v1360_v60 }
 0x1c4   : > { %v1529_v43 = vpop.f32.mrf.mxu3 }
 0x1c5   : > { %v1429_v44 = vpop.f32.mrf.mxu1  ;;  %v1553_v38 = vpop.f32.mrf.mxu0 }
 0x1c6   : > { %v1491_v39 = vpop.f32.mrf.mxu2  ;;  %v1554_v31 = vadd.f32 %v1553_v38, %v1518_v0  ;;  %v1430_v25 = vadd.f32 %v1429_v44, %v1396_v11  ;;  %v5056_v44 = vand.u32 4294901760, %v4981_v51 }
 0x1c8   : > { %v1492_v37 = vadd.f32 %v1491_v39, %v1430_v25 }
 0x1ca   : > { %v1530_v46 = vadd.f32 %v1529_v43, %v1492_v37  ;;  %v522_v43 = vld [vmem:[%s5411_s3] sm:$0xff] }
 0x1cc   : > { %v1668_v58 = vpop.f32.mrf.mxu3 }
 0x1cd   : > { %v1558_v19 = vpop.f32.mrf.mxu0  ;;  %v1592_v55 = vpop.f32.mrf.mxu1 }
 0x1ce   : > { %v1593_v52 = vadd.f32 %v1592_v55, %v1554_v31  ;;  %v1634_v26 = vpop.f32.mrf.mxu2  ;;  %v1559_v36 = vadd.f32 %v1558_v19, %v1522_v62  ;;  %v1484_v31 = vadd.f32 %v1483_v63, %v1426_v49  ;;  %v1896_v62 = vsel %vm533_vm0, %v522_v43, 0 }
 0x1d0   : > { %v1635_v45 = vadd.f32 %v1634_v26, %v1593_v52  ;;  %v1526_v14 = vadd.f32 %v1525_v41, %v1484_v31  ;;  %v5066_v52 = vsub.f32 %v4981_v51, %v5056_v44  ;;  %v1713_v26 = vand.u32 4294901760, %v1712_v32 }
 0x1d2   : > { %v5044_v6 = vadd.f32 %v1668_v58, %v1635_v45  ;;  %v1714_v51 = vsub.f32 %v1712_v32, %v1713_v26 }
 0x1d4   : > { %2339 = vst [vmem:[%s5046_s21] sm:$0xff] %v5044_v6  ;;  %v1672_v38 = vpop.f32.mrf.mxu3  ;;  %v5075_v49 = vand.u32 4294901760, %v5044_v6 }
 0x1d5   : > { %v1598_v42 = vpop.f32.mrf.mxu1  ;;  %v1563_v7 = vpop.f32.mrf.mxu0 }
 0x1d6   : > { %v1599_v1 = vadd.f32 %v1598_v42, %v1559_v36  ;;  %v1638_v5 = vpop.f32.mrf.mxu2  ;;  %v1564_v27 = vadd.f32 %v1563_v7, %v1526_v14  ;;  %v1941_v42 = vand.u32 4294901760, %v5066_v52  ;;  %v1751_v7 = vsub.f32 %v5044_v6, %v5075_v49 }
 0x1d8   : > { %v1639_v13 = vadd.f32 %v1638_v5, %v1599_v1  ;;  %v5081_v1 = vand.u32 4294901760, %v1896_v62  ;;  %v1942_v14 = vsub.f32 %v5066_v52, %v1941_v42 }
 0x1da   : > { %v1673_v58 = vadd.f32 %v1672_v38, %v1639_v13  ;;  %v1715_v13 = vand.u32 4294901760, %v1714_v51  ;;  %v5090_v16 = vsub.f32 %v1896_v62, %v5081_v1  ;;  %v5467_v62 = vld [vmem:[#allocation23_spill] sm:$0xff] }
 0x1dc   : > { %2340 = vst [vmem:[%s5046_s21 + $0x8] sm:$0xff] %v1673_v58  ;;  %v1676_v4 = vpop.f32.mrf.mxu3  ;;  %v5068_v40 = vand.u32 4294901760, %v1673_v58 }
 0x1dd   : > { %v1604_v28 = vpop.f32.mrf.mxu1  ;;  %v1568_v63 = vpop.f32.mrf.mxu0 }
 0x1de   : > { %v1605_v54 = vadd.f32 %v1604_v28, %v1564_v27  ;;  %v1642_v61 = vpop.f32.mrf.mxu2  ;;  %v1569_v41 = vadd.f32 %v1568_v63, %v1530_v46  ;;  %v1745_v31 = vsub.f32 %v1673_v58, %v5068_v40  ;;  %v1752_v28 = vand.u32 4294901760, %v1751_v7 }
 0x1e0   : > { %v1643_v8 = vadd.f32 %v1642_v61, %v1605_v54  ;;  %v1746_v58 = vand.u32 4294901760, %v1745_v31  ;;  %v5096_v54 = vand.u32 4294901760, %v5090_v16  ;;  %v2059_v61 = vand.u32 4294901760, %v4978_v48 }
 0x1e1   : > { %v1753_v63 = vsub.f32 %v1751_v7, %v1752_v28 }
 0x1e2   : > { %v1677_v20 = vadd.f32 %v1676_v4, %v1643_v8  ;;  %v1943_v4 = vand.u32 4294901760, %v1942_v14  ;;  %v1747_v37 = vsub.f32 %v1745_v31, %v1746_v58 }
 0x1e4   : > { %2341 = vst [vmem:[%s5046_s21 + $0x10] sm:$0xff] %v1677_v20  ;;  %v1680_v55 = vpop.f32.mrf.mxu3  ;;  %v5059_v50 = vand.u32 4294901760, %v1677_v20  ;;  %v1748_v46 = vand.u32 4294901760, %v1747_v37 }
 0x1e5   : > { %v1610_v0 = vpop.f32.mrf.mxu1 }
 0x1e6   : > { %v1611_v19 = vadd.f32 %v1610_v0, %v1569_v41  ;;  %v1646_v39 = vpop.f32.mrf.mxu2  ;;  %v1739_v38 = vsub.f32 %v1677_v20, %v5059_v50  ;;  %v1918_v20 = vsub.f32 %v5090_v16, %v5096_v54  ;;  %v2086_v41 = vsub.f32 %v4978_v48, %v2059_v61 }
 0x1e7   : > { %v2232_v0 = vsub.f32 %v4992_v2, %v2205_v9 }
 0x1e8   : > { %v1647_v3 = vadd.f32 %v1646_v39, %v1611_v19  ;;  %v1740_v11 = vand.u32 4294901760, %v1739_v38  ;;  %v1754_v19 = vand.u32 4294901760, %v1753_v63  ;;  %v2087_v39 = vand.u32 4294901760, %v2086_v41 }
 0x1e9   : > { %v2233_v48 = vand.u32 4294901760, %v2232_v0 }
 0x1ea   : > { %v1681_v45 = vadd.f32 %v1680_v55, %v1647_v3  ;;  %v1741_v27 = vsub.f32 %v1739_v38, %v1740_v11  ;;  %v2088_v2 = vsub.f32 %v2086_v41, %v2087_v39 }
 0x1eb   : > { %v2234_v55 = vsub.f32 %v2232_v0, %v2233_v48 }
 0x1ec   : > { %v1703_v36 = vand.u32 4294901760, %v1681_v45  ;;  %2342 = vst [vmem:[%s5046_s21 + $0x18] sm:$0xff] %v1681_v45  ;;  %v1742_v8 = vand.u32 4294901760, %v1741_v27  ;;  %v2089_v3 = vand.u32 4294901760, %v2088_v2 }
 0x1ed   : > { %v2235_v43 = vand.u32 4294901760, %v2234_v55 }
 0x1ee   : > { %v1733_v60 = vsub.f32 %v1681_v45, %v1703_v36  ;;  %1704 = vmatpush.msrb.mxu0 %v1703_v36  ;;  %1804 = vmatpush.msrb.mxu3 %v1703_v36  ;;  %v5466_v45 = vld [vmem:[#allocation24_spill] sm:$0xff] }
 0x1f0   : > { %1706 = vmatpush.msrb.mxu0 %v5059_v50  ;;  %1775 = vmatpush.msrb.mxu2 %v1733_v60  ;;  %v1734_v5 = vand.u32 4294901760, %v1733_v60 }
 0x1f1   : > { %1806 = vmatpush.msrb.mxu3 %v5059_v50 }
 0x1f2   : > { %1708 = vmatpush.msrb.mxu0 %v5068_v40  ;;  %1778 = vmatpush.msrb.mxu2 %v1739_v38  ;;  %v1735_v25 = vsub.f32 %v1733_v60, %v1734_v5 }
 0x1f3   : > { %1808 = vmatpush.msrb.mxu3 %v5068_v40 }
 0x1f4   : > { %1710 = vmatpush.msrb.mxu0 %v5075_v49  ;;  %1781 = vmatpush.msrb.mxu2 %v1745_v31  ;;  %v1736_v6 = vand.u32 4294901760, %v1735_v25 }
 0x1f5   : > { %1810 = vmatpush.msrb.mxu3 %v5075_v49  ;;  %1716 = vmatmul.f32.vlgmr.msrb.gmra.mxu0 %v1715_v13 }
 0x1f6   : > { %1814 = vmatmul.f32.vlgmr.msrb.gmra.mxu3 %v1713_v26  ;;  %1833 = vmatpush.msra.mxu0 %v1734_v5 }
 0x1f7   : > { %1944 = vmatpush.msra.mxu3 %v1943_v4  ;;  %1737 = vmatpush.msrb.mxu1 %v1736_v6 }
 0x1f8   : > { %1784 = vmatpush.msrb.mxu2 %v1751_v7  ;;  %1837 = vmatpush.msra.mxu0 %v1740_v11 }
 0x1f9   : > { %2038 = vmatpush.msrb.mxu3 %v5056_v44  ;;  %1787 = vmatmul.f32.vlgmr.msrb.gmra.mxu2 %v1712_v32  ;;  %v1919_v32 = vand.u32 4294901760, %v1918_v20 }
 0x1fa   : > { %1914 = vmatpush.msra.mxu2 %v5056_v44  ;;  %1743 = vmatpush.msrb.mxu1 %v1742_v8 }
 0x1fb   : > { %1841 = vmatpush.msra.mxu0 %v1746_v58 }
 0x1fc   : > { %2016 = vmatpush.msrb.mxu2 %v1941_v42  ;;  %1749 = vmatpush.msrb.mxu1 %v1748_v46 }
 0x1fd   : > { %1845 = vmatpush.msra.mxu0 %v1752_v28 }
 0x1fe   : > { %1755 = vmatpush.msrb.mxu1 %v1754_v19  ;;  %1847 = vmatmul.f32.vlgmr.msra.gmra.mxu0 %v5052_v59 }
 0x1ff   : > { %1967 = vmatpush.msrb.mxu0 %v5066_v52  ;;  %1757 = vmatmul.f32.vlgmr.msrb.gmra.mxu1 %v5052_v59 }
 0x200   : > { %1864 = vmatpush.msra.mxu1 %v1703_v36  ;;  %1946 = vmatmul.f32.vlgmr.msra.gmra.mxu3 %v5081_v1  ;;  %v5470_v36 = vld [vmem:[#allocation27_spill] sm:$0xff] }
 0x201   : > { %2060 = vmatpush.msra.mxu0 %v2059_v61  ;;  %2136 = vmatpush.msra.mxu3 %v2059_v61 }
 0x202   : > { %1866 = vmatpush.msra.mxu1 %v5059_v50  ;;  %1920 = vmatmul.f32.vlgmr.msra.gmra.mxu2 %v1919_v32  ;;  %v4370_v50 = vld [vmem:[%s5410_s2 + $0x8] sm:$0xff] }
 0x203   : > { %2113 = vmatpush.msra.mxu2 %v2086_v41 }
 0x204   : > { %1868 = vmatpush.msra.mxu1 %v5068_v40 }
 0x206   : > { %1870 = vmatpush.msra.mxu1 %v5075_v49  ;;  %1970 = vmatmul.f32.vlgmr.msrb.gmra.mxu0 %v5090_v16  ;;  %v5468_v49 = vld [vmem:[#allocation26_spill] sm:$0xff] }
 0x207   : > { %1872 = vmatmul.f32.vlgmr.msra.gmra.mxu1 %v5052_v59  ;;  %2162 = vmatpush.msrb.mxu0 %v2087_v39  ;;  %v2367_v59 = vsel %vm533_vm0, %v4370_v50, 0 }
 0x208   : > { %1990 = vmatpush.msrb.mxu1 %v5056_v44  ;;  %2040 = vmatmul.f32.vlgmr.msrb.gmra.mxu3 %v5081_v1  ;;  %v5125_v44 = vand.u32 4294901760, %v2367_v59 }
 0x209   : > { %2236 = vmatpush.msrb.mxu3 %v2235_v43 }
 0x20a   : > { %2090 = vmatpush.msra.mxu1 %v2089_v3  ;;  %2018 = vmatmul.f32.vlgmr.msrb.gmra.mxu2 %v5081_v1  ;;  %v2387_v57 = vsub.f32 %v2367_v59, %v5125_v44 }
 0x20b   : > { %2206 = vmatpush.msrb.mxu2 %v2205_v9 }
 0x20c   : > { %v2388_v52 = vand.u32 4294901760, %v2387_v57 }
 0x20e   : > { %2066 = vmatmul.f32.vlgmr.msra.gmra.mxu0 %v1919_v32  ;;  %v2389_v26 = vsub.f32 %v2387_v57, %v2388_v52 }
 0x20f   : > { %1994 = vmatmul.f32.vlgmr.msrb.gmra.mxu1 %v5096_v54  ;;  %2259 = vmatpush.msra.mxu0 %v2232_v0 }
 0x210   : > { %2140 = vmatmul.f32.vlgmr.msra.gmra.mxu3 %v5096_v54  ;;  %2184 = vmatpush.msrb.mxu1 %v2059_v61  ;;  %v2390_v40 = vand.u32 4294901760, %v2389_v26 }
 0x211   : > { %2330 = vmatpush.msra.mxu3 %v2205_v9 }
 0x212   : > { %2116 = vmatmul.f32.vlgmr.msra.gmra.mxu2 %v5090_v16 }
 0x213   : > { %2308 = vmatpush.msra.mxu2 %v2233_v48 }
 0x216   : > { %2164 = vmatmul.f32.vlgmr.msrb.gmra.mxu0 %v5081_v1 }
 0x217   : > { %2092 = vmatmul.f32.vlgmr.msra.gmra.mxu1 %v5081_v1  ;;  %2385 = vmatpush.msrb.mxu0 %v4813_v10 }
 0x218   : > { %2238 = vmatmul.f32.vlgmr.msrb.gmra.mxu3 %v5081_v1  ;;  %2282 = vmatpush.msra.mxu1 %v2205_v9 }
 0x219   : > { %2461 = vmatpush.msrb.mxu3 %v4813_v10 }
 0x21a   : > { %2212 = vmatmul.f32.vlgmr.msrb.gmra.mxu2 %v1919_v32 }
 0x21b   : > { %2438 = vmatpush.msrb.mxu2 %v4824_v17  ;;  %v2347_v17 = vld [vmem:[#allocation4 + $0x8] sm:$0xff] }
 0x21e   : > { %2262 = vmatmul.f32.vlgmr.msra.gmra.mxu0 %v5090_v16 }
 0x21f   : > { %2186 = vmatmul.f32.vlgmr.msrb.gmra.mxu1 %v5081_v1  ;;  %2487 = vmatpush.msra.mxu0 %v4837_v21  ;;  %v5459_v21 = vld [vmem:[#allocation28_spill] sm:$0xff] }
 0x220   : > { %2332 = vmatmul.f32.vlgmr.msra.gmra.mxu3 %v5081_v1  ;;  %2415 = vmatpush.msrb.mxu1 %v4867_v33  ;;  %v5461_v33 = vld [vmem:[#allocation21_spill] sm:$0xff] }
 0x221   : > { %2561 = vmatpush.msra.mxu3 %v4869_v34  ;;  %v5462_v34 = vld [vmem:[#allocation29_spill] sm:$0xff] }
 0x222   : > { %2310 = vmatmul.f32.vlgmr.msra.gmra.mxu2 %v5081_v1 }
 0x223   : > { %2531 = vmatpush.msra.mxu2 %v4816_v12 }
 0x226   : > { %2391 = vmatmul.f32.vlgmr.msrb.gmra.mxu0 %v2390_v40 }
 0x227   : > { %2286 = vmatmul.f32.vlgmr.msra.gmra.mxu1 %v5096_v54  ;;  %2584 = vmatpush.msrb.mxu0 %v4829_v18 }
 0x228   : > { %2465 = vmatmul.f32.vlgmr.msrb.gmra.mxu3 %v2388_v52  ;;  %2509 = vmatpush.msra.mxu1 %v4813_v10  ;;  %v2825_v10 = vsel %vm992_vm1, %v2347_v17, 0 }
 0x229   : > { %2655 = vmatpush.msrb.mxu3 %v4816_v12  ;;  %v2847_v18 = vand.u32 4294901760, %v2825_v10 }
 0x22a   : > { %2441 = vmatmul.f32.vlgmr.msrb.gmra.mxu2 %v2387_v57 }
 0x22b   : > { %2633 = vmatpush.msrb.mxu2 %v4840_v22 }
 0x22e   : > { %2489 = vmatmul.f32.vlgmr.msra.gmra.mxu0 %v5125_v44  ;;  %v1686_v38 = vpop.permute.xlu0 %1685 }
 0x22f   : > { %2417 = vmatmul.f32.vlgmr.msrb.gmra.mxu1 %v5125_v44  ;;  %2677 = vmatpush.msra.mxu0 %v4820_v15 }
 0x230   : > { %2563 = vmatmul.f32.vlgmr.msra.gmra.mxu3 %v5125_v44  ;;  %2607 = vmatpush.msrb.mxu1 %v4816_v12  ;;  %v2848_v12 = vsub.f32 %v2825_v10, %v2847_v18 }
 0x231   : > { %2753 = vmatpush.msra.mxu3 %v4820_v15 }
 0x232   : > { %2537 = vmatmul.f32.vlgmr.msra.gmra.mxu2 %v2390_v40  ;;  %v2849_v22 = vand.u32 4294901760, %v2848_v12 }
 0x233   : > { %2730 = vmatpush.msra.mxu2 %v4843_v23  ;;  %v5460_v23 = vld [vmem:[#allocation18_spill] sm:$0xff] }
 0x236   : > { %2587 = vmatmul.f32.vlgmr.msrb.gmra.mxu0 %v2387_v57 }
 0x237   : > { %2511 = vmatmul.f32.vlgmr.msra.gmra.mxu1 %v5125_v44  ;;  %2779 = vmatpush.msrb.mxu0 %v4872_v35  ;;  %v2850_v35 = vsub.f32 %v2848_v12, %v2849_v22 }
 0x238   : > { %2657 = vmatmul.f32.vlgmr.msrb.gmra.mxu3 %v5125_v44  ;;  %2707 = vmatpush.msra.mxu1 %v4911_v47  ;;  %v5463_v47 = vld [vmem:[#allocation19_spill] sm:$0xff] }
 0x239   : > { %2873 = vmatpush.msrb.mxu3 %v4927_v53  ;;  %v5464_v53 = vld [vmem:[#allocation22_spill] sm:$0xff]  ;;  %v2851_v30 = vand.u32 4294901760, %v2850_v35 }
 0x23a   : > { %2635 = vmatmul.f32.vlgmr.msrb.gmra.mxu2 %v5125_v44 }
 0x23b   : > { %2840 = vmatpush.msrb.mxu2 %v4845_v24  ;;  %2879 = vmatpush.msrb.mxu3 %v4933_v56  ;;  %v5465_v56 = vld [vmem:[#allocation20_spill] sm:$0xff] }
 0x23d   : > { %2842 = vmatpush.msrb.mxu2 %v4858_v29  ;;  %2885 = vmatpush.msrb.mxu3 %v5459_v21 }
 0x23e   : > { %2683 = vmatmul.f32.vlgmr.msra.gmra.mxu0 %v2390_v40 }
 0x23f   : > { %2844 = vmatpush.msrb.mxu2 %v5460_v23  ;;  %2611 = vmatmul.f32.vlgmr.msrb.gmra.mxu1 %v2388_v52 }
 0x240   : > { %2757 = vmatmul.f32.vlgmr.msra.gmra.mxu3 %v2388_v52  ;;  %2911 = vmatpush.msra.mxu0 %v5463_v47 }
 0x241   : > { %2846 = vmatpush.msrb.mxu2 %v5461_v33  ;;  %2891 = vmatpush.msrb.mxu3 %v5462_v34 }
 0x242   : > { %2733 = vmatmul.f32.vlgmr.msra.gmra.mxu2 %v2387_v57  ;;  %2801 = vmatpush.msrb.mxu1 %v4820_v15  ;;  %v5469_v15 = vld [vmem:[#allocation25_spill] sm:$0xff] }
 0x243   : > { %2969 = vmatpush.msra.mxu2 %v5464_v53  ;;  %2914 = vmatpush.msra.mxu0 %v5465_v56 }
 0x244   : > { %3000 = vmatpush.msra.mxu3 %v4845_v24 }
 0x245   : > { %2973 = vmatpush.msra.mxu2 %v5466_v45  ;;  %2917 = vmatpush.msra.mxu0 %v5467_v62 }
 0x246   : > { %3002 = vmatpush.msra.mxu3 %v4858_v29  ;;  %2781 = vmatmul.f32.vlgmr.msrb.gmra.mxu0 %v5125_v44 }
 0x247   : > { %2977 = vmatpush.msra.mxu2 %v5468_v49  ;;  %2709 = vmatmul.f32.vlgmr.msra.gmra.mxu1 %v5125_v44 }
 0x248   : > { %2893 = vmatmul.f32.vlgmr.msrb.gmra.mxu3 %v2847_v18  ;;  %2940 = vmatpush.msra.mxu1 %v4845_v24 }
 0x249   : > { %2920 = vmatpush.msra.mxu0 %v5469_v15  ;;  %3004 = vmatpush.msra.mxu3 %v5460_v23 }
 0x24a   : > { %2852 = vmatmul.f32.vlgmr.msrb.gmra.mxu2 %v2851_v30  ;;  %2942 = vmatpush.msra.mxu1 %v4858_v29 }
 0x24b   : > { %2981 = vmatpush.msra.mxu2 %v5470_v36  ;;  %3006 = vmatpush.msra.mxu3 %v5461_v33 }
 0x24c   : > { %2944 = vmatpush.msra.mxu1 %v5460_v23 }
 0x24e   : > { %2923 = vmatmul.f32.vlgmr.msra.gmra.mxu0 %v2848_v12  ;;  %2946 = vmatpush.msra.mxu1 %v5461_v33 }
 0x24f   : > { %2803 = vmatmul.f32.vlgmr.msrb.gmra.mxu1 %v5125_v44 }
 0x250   : > { %3008 = vmatmul.f32.vlgmr.msra.gmra.mxu3 %v2847_v18 }
 0x252   : > { %2983 = vmatmul.f32.vlgmr.msra.gmra.mxu2 %v2847_v18 }
 0x257   : > { %2950 = vmatmul.f32.vlgmr.msra.gmra.mxu1 %v2849_v22 }
 0x272   : > { %v1717_v24 = vpop.f32.mrf.mxu0 }
 0x273   : > { %v1718_v51 = vadd.f32 %v1717_v24, %v1686_v38 }
 0x279   : > { %v1815_v42 = vpop.f32.mrf.mxu3 }
 0x27b   : > { %v1848_v1 = vpop.f32.mrf.mxu0 }
 0x27c   : > { %v1758_v60 = vpop.f32.mrf.mxu1  ;;  %v1788_v29 = vpop.f32.mrf.mxu2 }
 0x27d   : > { %v1759_v31 = vadd.f32 %v1758_v60, %v1718_v51 }
 0x27f   : > { %v1789_v5 = vadd.f32 %v1788_v29, %v1759_v31 }
 0x281   : > { %v1816_v7 = vadd.f32 %v1815_v42, %v1789_v5 }
 0x283   : > { %v1849_v11 = vadd.f32 %v1848_v1, %v1816_v7  ;;  %v1947_v13 = vpop.f32.mrf.mxu3  ;;  %v1971_v16 = vpop.f32.mrf.mxu0 }
 0x284   : > { %v1873_v14 = vpop.f32.mrf.mxu1 }
 0x285   : > { %v1921_v25 = vpop.f32.mrf.mxu2  ;;  %v1874_v58 = vadd.f32 %v1873_v14, %v1849_v11 }
 0x286   : > { %v1948_v9 = vadd.f32 %v1947_v13, %v1921_v25 }
 0x287   : > { %v4369_v6 = vmul.f32 -1.442695, %v1874_v58 }
 0x288   : > { %v1972_v0 = vadd.f32 %v1971_v16, %v1948_v9 }
 0x289   : > { %4471 = vpow2.f32 %v4369_v6 }
 0x28b   : > { %v2041_v27 = vpop.f32.mrf.mxu3  ;;  %v2067_v37 = vpop.f32.mrf.mxu0 }
 0x28c   : > { %v1995_v28 = vpop.f32.mrf.mxu1 }
 0x28d   : > { %v2019_v4 = vpop.f32.mrf.mxu2  ;;  %v1996_v39 = vadd.f32 %v1995_v28, %v1972_v0 }
 0x28f   : > { %v4472_v54 = vpop.eup %4471  ;;  %v2020_v43 = vadd.f32 %v2019_v4, %v1996_v39 }
 0x290   : > { %v1879_v61 = vadd.f32 1.0, %v4472_v54  ;;  %v4376_v54 = vld [vmem:[%s5414_s6 + $0x20] sm:$0xff] }
 0x291   : > { %v2042_v21 = vadd.f32 %v2041_v27, %v2020_v43 }
 0x292   : > { %4473 = vrcp.f32 %v1879_v61  ;;  %v1891_v50 = vand.u32 2147483648, %v1879_v61  ;;  %v1889_v52 = vand.u32 2147483647, %v1879_v61  ;;  %vm1885_vm5 = vweird.f32 %v1879_v61 }
 0x293   : > { %v2141_v8 = vpop.f32.mrf.mxu3  ;;  %v2165_v41 = vpop.f32.mrf.mxu0 }
 0x294   : > { %v2093_v63 = vpop.f32.mrf.mxu1  ;;  %v1892_v18 = vor.u32 1.1754944e-38, %v1891_v50  ;;  %vm1890_vm7 = vcmp.eq.f32.partialorder %v1889_v52, 8.507059e+37 }
 0x295   : > { %v2117_v46 = vpop.f32.mrf.mxu2  ;;  %v2094_v20 = vadd.f32 %v2093_v63, %v2067_v37 }
 0x297   : > { %v2118_v19 = vadd.f32 %v2117_v46, %v2094_v20  ;;  %v3013_v20 = vsel %vm533_vm0, %v4376_v54, 0  ;;  %v4372_v54 = vld [vmem:[%s5413_s5 + $0x20] sm:$0xff] }
 0x298   : > { %v4474_v32 = vpop.eup %4473 }
 0x299   : > { %v1881_v48 = vmul.f32 %v4474_v32, %v1879_v61  ;;  %v2142_v2 = vadd.f32 %v2141_v8, %v2118_v19  ;;  %vm1886_vm4 = vweird.f32 %v4474_v32  ;;  %v5202_v19 = vand.u32 4294901760, %v3013_v20 }
 0x29a   : > { %vm1887_vm6 = vmor %vm1885_vm5, %vm1886_vm4 }
 0x29b   : > { %v2239_v55 = vpop.f32.mrf.mxu3  ;;  %v1882_v3 = vsub.f32 1.0, %v1881_v48  ;;  %v2166_v26 = vadd.f32 %v2165_v41, %v2142_v2  ;;  %v2263_v40 = vpop.f32.mrf.mxu0 }
 0x29c   : > { %v2187_v59 = vpop.f32.mrf.mxu1 }
 0x29d   : > { %v2213_v44 = vpop.f32.mrf.mxu2  ;;  %v1883_v57 = vmul.f32 %v4474_v32, %v1882_v3  ;;  %v2188_v22 = vadd.f32 %v2187_v59, %v2166_v26  ;;  %v4377_v3 = vld [vmem:[%s5414_s6 + $0x28] sm:$0xff]  ;;  %v3042_v59 = vsub.f32 %v3013_v20, %v5202_v19 }
 0x29e   : > { %v2240_v10 = vadd.f32 %v2239_v55, %v2213_v44  ;;  %v3016_v26 = vsel %vm533_vm0, %v4377_v3, 0 }
 0x29f   : > { %v1884_v17 = vadd.f32 %v4474_v32, %v1883_v57 }
 0x2a0   : > { %v2264_v47 = vadd.f32 %v2263_v40, %v2240_v10  ;;  %v3043_v10 = vand.u32 4294901760, %v3042_v59 }
 0x2a1   : > { %v1888_v12 = vsel %vm1887_vm6, %v4474_v32, %v1884_v17 }
 0x2a2   : > { %v1893_v23 = vsel %vm1890_vm7, %v1892_v18, %v1888_v12  ;;  %v5217_v18 = vand.u32 4294901760, %v3016_v26 }
 0x2a3   : > { %v2333_v33 = vpop.f32.mrf.mxu3  ;;  %v2336_v34 = vmul.f32 %v2042_v21, %v1893_v23  ;;  %v2337_v35 = vmul.f32 %v2188_v22, %v1893_v23  ;;  %v2392_v30 = vpop.f32.mrf.mxu0 }
 0x2a4   : > { %v2287_v53 = vpop.f32.mrf.mxu1 }
 0x2a5   : > { %v2311_v56 = vpop.f32.mrf.mxu2  ;;  %2343 = vst [vmem:[%s5189_s19] sm:$0xff] %v2336_v34  ;;  %v2288_v45 = vadd.f32 %v2287_v53, %v2264_v47  ;;  %v3050_v47 = vsub.f32 %v3016_v26, %v5217_v18  ;;  %v4374_v26 = vld [vmem:[%s5413_s5 + $0x30] sm:$0xff] }
 0x2a6   : > { %2344 = vst [vmem:[%s5189_s19 + $0x8] sm:$0xff] %v2337_v35  ;;  %v3044_v35 = vsub.f32 %v3042_v59, %v3043_v10 }
 0x2a7   : > { %v2312_v62 = vadd.f32 %v2311_v56, %v2288_v45 }
 0x2a9   : > { %v2334_v49 = vadd.f32 %v2333_v33, %v2312_v62  ;;  %v3045_v62 = vand.u32 4294901760, %v3044_v35 }
 0x2ab   : > { %v2466_v15 = vpop.f32.mrf.mxu3  ;;  %v2338_v36 = vmul.f32 %v2334_v49, %v1893_v23  ;;  %v2490_v51 = vpop.f32.mrf.mxu0  ;;  %v4378_v23 = vld [vmem:[%s5414_s6 + $0x30] sm:$0xff]  ;;  %v3051_v49 = vand.u32 4294901760, %v3050_v47 }
 0x2ac   : > { %v2418_v24 = vpop.f32.mrf.mxu1  ;;  %v3019_v56 = vsel %vm533_vm0, %v4378_v23, 0  ;;  %v4375_v23 = vld [vmem:[%s5413_s5 + $0x38] sm:$0xff] }
 0x2ad   : > { %v2442_v38 = vpop.f32.mrf.mxu2  ;;  %2345 = vst [vmem:[%s5189_s19 + $0x10] sm:$0xff] %v2338_v36  ;;  %v2419_v1 = vadd.f32 %v2418_v24, %v2392_v30  ;;  %v5224_v36 = vand.u32 4294901760, %v3019_v56  ;;  %v3273_v35 = vsel %vm533_vm0, %v4375_v23, 0 }
 0x2af   : > { %v2443_v14 = vadd.f32 %v2442_v38, %v2419_v1 }
 0x2b1   : > { %v2467_v6 = vadd.f32 %v2466_v15, %v2443_v14 }
 0x2b3   : > { %v2564_v42 = vpop.f32.mrf.mxu3  ;;  %v2588_v31 = vpop.f32.mrf.mxu0  ;;  %v2491_v61 = vadd.f32 %v2490_v51, %v2467_v6  ;;  %v4379_v51 = vld [vmem:[%s5414_s6 + $0x38] sm:$0xff] }
 0x2b4   : > { %v2512_v60 = vpop.f32.mrf.mxu1 }
 0x2b5   : > { %v2538_v29 = vpop.f32.mrf.mxu2  ;;  %v5200_v41 = vadd.f32 %v2512_v60, %v2491_v61  ;;  %v3052_v60 = vsub.f32 %v3050_v47, %v3051_v49 }
 0x2b6   : > { %v2565_v5 = vadd.f32 %v2564_v42, %v2538_v29 }
 0x2b7   : > { %v2807_v43 = vmul.f32 %v5200_v41, %v5200_v41 }
 0x2b8   : > { %v2589_v25 = vadd.f32 %v2588_v31, %v2565_v5  ;;  %v3058_v31 = vsub.f32 %v3019_v56, %v5224_v36  ;;  %v3022_v5 = vsel %vm533_vm0, %v4379_v51, 0  ;;  %v3316_v56 = vand.u32 4294901760, %v3273_v35 }
 0x2bb   : > { %v2658_v7 = vpop.f32.mrf.mxu3  ;;  %v2684_v58 = vpop.f32.mrf.mxu0 }
 0x2bc   : > { %v2612_v11 = vpop.f32.mrf.mxu1 }
 0x2bd   : > { %v2636_v13 = vpop.f32.mrf.mxu2  ;;  %v2613_v16 = vadd.f32 %v2612_v11, %v2589_v25  ;;  %v3059_v25 = vand.u32 4294901760, %v3058_v31 }
 0x2bf   : > { %v2637_v28 = vadd.f32 %v2636_v13, %v2613_v16  ;;  %v3053_v13 = vand.u32 4294901760, %v3052_v60 }
 0x2c1   : > { %v5197_v63 = vadd.f32 %v2658_v7, %v2637_v28 }
 0x2c3   : > { %v2758_v27 = vpop.f32.mrf.mxu3  ;;  %v2782_v8 = vpop.f32.mrf.mxu0  ;;  %v2808_v32 = vmul.f32 %v5197_v63, %v5197_v63 }
 0x2c4   : > { %v2710_v4 = vpop.f32.mrf.mxu1 }
 0x2c5   : > { %v2734_v37 = vpop.f32.mrf.mxu2  ;;  %v2711_v9 = vadd.f32 %v2710_v4, %v2684_v58  ;;  %v2810_v44 = vadd.f32 %v2808_v32, %v2807_v43  ;;  %v5231_v58 = vand.u32 4294901760, %v3022_v5  ;;  %v3060_v4 = vsub.f32 %v3058_v31, %v3059_v25 }
 0x2c7   : > { %v2735_v46 = vadd.f32 %v2734_v37, %v2711_v9  ;;  %v3066_v37 = vsub.f32 %v3022_v5, %v5231_v58  ;;  %v3061_v20 = vand.u32 4294901760, %v3060_v4 }
 0x2c9   : > { %v2759_v0 = vadd.f32 %v2758_v27, %v2735_v46 }
 0x2cb   : > { %v2783_v39 = vadd.f32 %v2782_v8, %v2759_v0  ;;  %v2894_v48 = vpop.f32.mrf.mxu3  ;;  %v2924_v40 = vpop.f32.mrf.mxu0  ;;  %v3264_v8 = vsel %vm533_vm0, %v4372_v54, 0  ;;  %v3067_v0 = vand.u32 4294901760, %v3066_v37 }
 0x2cc   : > { %v2804_v2 = vpop.f32.mrf.mxu1 }
 0x2cd   : > { %v2853_v55 = vpop.f32.mrf.mxu2  ;;  %v5211_v50 = vadd.f32 %v2804_v2, %v2783_v39  ;;  %v3292_v39 = vand.u32 4294901760, %v3264_v8  ;;  %v3068_v2 = vsub.f32 %v3066_v37, %v3067_v0 }
 0x2ce   : > { %v2895_v52 = vadd.f32 %v2894_v48, %v2853_v55  ;;  %v4373_v55 = vld [vmem:[%s5413_s5 + $0x28] sm:$0xff] }
 0x2cf   : > { %v2809_v57 = vmul.f32 %v5211_v50, %v5211_v50  ;;  %v3293_v43 = vsub.f32 %v3264_v8, %v3292_v39 }
 0x2d0   : > { %v2925_v12 = vadd.f32 %v2924_v40, %v2895_v52 }
 0x2d1   : > { %v2811_v17 = vadd.f32 %v2810_v44, %v2809_v57  ;;  %v3069_v44 = vand.u32 4294901760, %v3068_v2  ;;  %v3294_v57 = vand.u32 4294901760, %v3293_v43 }
 0x2d3   : > { %4475 = vrsqrt.f32 %v2811_v17  ;;  %v3009_v34 = vpop.f32.mrf.mxu3  ;;  %vm2819_vm8 = vcmp.eq.f32.partialorder %v2811_v17, inf  ;;  %v2822_v27 = vand.u32 2147483648, %v2811_v17  ;;  %vm2821_vm9 = vcmp.eq.f32.partialorder %v2811_v17, 0.0 }
 0x2d4   : > { %v2951_v21 = vpop.f32.mrf.mxu1  ;;  %v3295_v40 = vsub.f32 %v3293_v43, %v3294_v57 }
 0x2d5   : > { %v2984_v22 = vpop.f32.mrf.mxu2  ;;  %v2952_v33 = vadd.f32 %v2951_v21, %v2925_v12 }
 0x2d6   : > { %v3296_v12 = vand.u32 4294901760, %v3295_v40 }
 0x2d7   : > { %v2985_v53 = vadd.f32 %v2984_v22, %v2952_v33 }
 0x2d9   : > { %v4476_v45 = vpop.eup %4475  ;;  %v3010_v30 = vadd.f32 %v3009_v34, %v2985_v53 }
 0x2da   : > { %v2813_v15 = vmul.f32 %v4476_v45, %v2811_v17 }
 0x2db   : > { %v3039_v24 = vand.u32 4294901760, %v3010_v30 }
 0x2dc   : > { %v2814_v38 = vmul.f32 %v4476_v45, %v2813_v15 }
 0x2dd   : > { %v3090_v42 = vsub.f32 %v3010_v30, %v3039_v24  ;;  %3040 = vmatpush.msrb.mxu0 %v3039_v24  ;;  %3167 = vmatpush.msrb.mxu3 %v3039_v24  ;;  %v3317_v30 = vsub.f32 %v3273_v35, %v3316_v56 }
 0x2de   : > { %3046 = vmatmul.f32.vlgmr.msrb.gmra.mxu0 %v3045_v62  ;;  %3171 = vmatmul.f32.vlgmr.msrb.gmra.mxu3 %v3043_v10  ;;  %v2815_v29 = vmul.f32 0.5, %v2814_v38  ;;  %v3270_v10 = vsel %vm533_vm0, %v4374_v26, 0 }
 0x2df   : > { %v3091_v1 = vand.u32 4294901760, %v3090_v42  ;;  %3129 = vmatpush.msrb.mxu2 %v3090_v42  ;;  %v3308_v22 = vand.u32 4294901760, %v3270_v10 }
 0x2e0   : > { %3132 = vmatmul.f32.vlgmr.msrb.gmra.mxu2 %v3042_v59  ;;  %v2816_v7 = vsub.f32 1.5, %v2815_v29  ;;  %v3267_v59 = vsel %vm533_vm0, %v4373_v55, 0 }
 0x2e1   : > { %v3092_v11 = vsub.f32 %v3090_v42, %v3091_v1  ;;  %3211 = vmatpush.msra.mxu0 %v3091_v1  ;;  %v3300_v52 = vand.u32 4294901760, %v3267_v59  ;;  %v3309_v34 = vsub.f32 %v3270_v10, %v3308_v22 }
 0x2e2   : > { %v2817_v14 = vmul.f32 %v4476_v45, %v2816_v7 }
 0x2e3   : > { %v3093_v16 = vand.u32 4294901760, %v3092_v11  ;;  %v3310_v53 = vand.u32 4294901760, %v3309_v34 }
 0x2e4   : > { %v2818_v6 = vmul.f32 %v2817_v14, %v2811_v17 }
 0x2e5   : > { %3094 = vmatpush.msrb.mxu1 %v3093_v16  ;;  %v3311_v45 = vsub.f32 %v3309_v34, %v3310_v53 }
 0x2e6   : > { %3054 = vmatmul.f32.gmra.mxu0 %v3053_v13  ;;  %3096 = vmatmul.f32.vlgmr.msrb.gmra.mxu1 %v5202_v19  ;;  %v2820_v28 = vsel %vm2819_vm8, %v2811_v17, %v2818_v6  ;;  %v3301_v17 = vsub.f32 %v3267_v59, %v3300_v52 }
 0x2e7   : > { %3245 = vmatpush.msra.mxu1 %v3039_v24  ;;  %v2823_v61 = vsel %vm2821_vm9, %v2822_v27, %v2820_v28  ;;  %3177 = vmatmul.f32.gmra.mxu3 %v3051_v49  ;;  %v3312_v62 = vand.u32 4294901760, %v3311_v45  ;;  %v3318_v49 = vand.u32 4294901760, %v3317_v30 }
 0x2e8   : > { %3137 = vmatmul.f32.gmra.mxu2 %v3050_v47  ;;  %v3290_v9 = vand.u32 4294901760, %v2823_v61  ;;  %v3302_v21 = vand.u32 4294901760, %v3301_v17 }
 0x2e9   : > { %v3319_v15 = vsub.f32 %v3317_v30, %v3318_v49 }
 0x2ea   : > { %3291 = vmatpush.msra.mxu2 %v3290_v9  ;;  %3418 = vmatpush.msrb.mxu1 %v3290_v9  ;;  %v3341_v46 = vsub.f32 %v2823_v61, %v3290_v9  ;;  %v3303_v33 = vsub.f32 %v3301_v17, %v3302_v21 }
 0x2eb   : > { %v3320_v24 = vand.u32 4294901760, %v3319_v15 }
 0x2ec   : > { %3380 = vmatpush.msrb.mxu0 %v3341_v46  ;;  %v3342_v32 = vand.u32 4294901760, %v3341_v46  ;;  %v3304_v47 = vand.u32 4294901760, %v3303_v33 }
 0x2ee   : > { %3062 = vmatmul.f32.gmra.mxu0 %v3061_v20  ;;  %3100 = vmatmul.f32.gmra.mxu1 %v5217_v18  ;;  %v3343_v48 = vsub.f32 %v3341_v46, %v3342_v32 }
 0x2ef   : > { %3462 = vmatpush.msrb.mxu2 %v3342_v32  ;;  %3183 = vmatmul.f32.gmra.mxu3 %v3059_v25 }
 0x2f0   : > { %3142 = vmatmul.f32.gmra.mxu2 %v3058_v31  ;;  %v3344_v3 = vand.u32 4294901760, %v3343_v48 }
 0x2f2   : > { %3345 = vmatpush.msra.mxu3 %v3344_v3 }
 0x2f4   : > { %3496 = vmatpush.msrb.mxu3 %v3290_v9 }
 0x2f6   : > { %3070 = vmatmul.f32.gmra.mxu0 %v3069_v44  ;;  %3104 = vmatmul.f32.gmra.mxu1 %v5224_v36 }
 0x2f7   : > { %3189 = vmatmul.f32.gmra.mxu3 %v3067_v0 }
 0x2f8   : > { %3147 = vmatmul.f32.gmra.mxu2 %v3066_v37 }
 0x2fe   : > { %3108 = vmatmul.f32.gmra.mxu1 %v5231_v58  ;;  %3213 = vmatmul.f32.vlgmr.msra.gmra.mxu0 %v5202_v19 }
 0x2ff   : > { %3347 = vmatmul.f32.vlgmr.msra.gmra.mxu3 %v3292_v39 }
 0x300   : > { %3297 = vmatmul.f32.vlgmr.msra.gmra.mxu2 %v3296_v12 }
 0x306   : > { %3217 = vmatmul.f32.gmra.mxu0 %v5217_v18  ;;  %3247 = vmatmul.f32.vlgmr.msra.gmra.mxu1 %v5202_v19 }
 0x307   : > { %3351 = vmatmul.f32.gmra.mxu3 %v3300_v52 }
 0x308   : > { %3305 = vmatmul.f32.gmra.mxu2 %v3304_v47 }
 0x30e   : > { %3221 = vmatmul.f32.gmra.mxu0 %v5224_v36  ;;  %3251 = vmatmul.f32.gmra.mxu1 %v5217_v18 }
 0x30f   : > { %3355 = vmatmul.f32.gmra.mxu3 %v3308_v22 }
 0x310   : > { %3313 = vmatmul.f32.gmra.mxu2 %v3312_v62 }
 0x316   : > { %3225 = vmatmul.f32.gmra.mxu0 %v5231_v58  ;;  %3255 = vmatmul.f32.gmra.mxu1 %v5224_v36 }
 0x317   : > { %3359 = vmatmul.f32.gmra.mxu3 %v3316_v56 }
 0x318   : > { %3321 = vmatmul.f32.gmra.mxu2 %v3320_v24 }
 0x31e   : > { %3259 = vmatmul.f32.gmra.mxu1 %v5231_v58  ;;  %3383 = vmatmul.f32.vlgmr.msrb.gmra.mxu0 %v3293_v43 }
 0x31f   : > { %3498 = vmatmul.f32.vlgmr.msrb.gmra.mxu3 %v3292_v39 }
 0x320   : > { %3464 = vmatmul.f32.vlgmr.msrb.gmra.mxu2 %v3292_v39 }
 0x326   : > { %3388 = vmatmul.f32.gmra.mxu0 %v3301_v17  ;;  %3422 = vmatmul.f32.vlgmr.msrb.gmra.mxu1 %v3294_v57 }
 0x327   : > { %3502 = vmatmul.f32.gmra.mxu3 %v3300_v52 }
 0x328   : > { %3468 = vmatmul.f32.gmra.mxu2 %v3300_v52 }
 0x32e   : > { %3393 = vmatmul.f32.gmra.mxu0 %v3309_v34  ;;  %3428 = vmatmul.f32.gmra.mxu1 %v3302_v21 }
 0x32f   : > { %3506 = vmatmul.f32.gmra.mxu3 %v3308_v22 }
 0x330   : > { %3472 = vmatmul.f32.gmra.mxu2 %v3308_v22 }
 0x336   : > { %3398 = vmatmul.f32.gmra.mxu0 %v3317_v30  ;;  %3434 = vmatmul.f32.gmra.mxu1 %v3310_v53 }
 0x337   : > { %3510 = vmatmul.f32.gmra.mxu3 %v3316_v56 }
 0x338   : > { %3476 = vmatmul.f32.gmra.mxu2 %v3316_v56 }
 0x33e   : > { %3440 = vmatmul.f32.gmra.mxu1 %v3318_v49 }
 0x35b   : > { %v3047_v19 = vpop.f32.mrf.mxu0 }
 0x361   : > { %v3172_v18 = vpop.f32.mrf.mxu3 }
 0x363   : > { %v3055_v36 = vpop.f32.mrf.mxu0  ;;  %v3097_v38 = vpop.f32.mrf.mxu1 }
 0x364   : > { %v3133_v51 = vpop.f32.mrf.mxu2  ;;  %v3098_v61 = vadd.f32 %v3097_v38, %v3047_v19 }
 0x366   : > { %v3134_v8 = vadd.f32 %v3133_v51, %v3098_v61 }
 0x368   : > { %v3173_v32 = vadd.f32 %v3172_v18, %v3134_v8 }
 0x36a   : > { %v3178_v42 = vpop.f32.mrf.mxu3 }
 0x36b   : > { %v3063_v60 = vpop.f32.mrf.mxu0  ;;  %v3101_v29 = vpop.f32.mrf.mxu1 }
 0x36c   : > { %v3138_v31 = vpop.f32.mrf.mxu2  ;;  %v3102_v39 = vadd.f32 %v3101_v29, %v3055_v36 }
 0x36e   : > { %v3139_v55 = vadd.f32 %v3138_v31, %v3102_v39 }
 0x370   : > { %v3179_v57 = vadd.f32 %v3178_v42, %v3139_v55 }
 0x372   : > { %v3184_v1 = vpop.f32.mrf.mxu3 }
 0x373   : > { %v3071_v5 = vpop.f32.mrf.mxu0  ;;  %v3105_v7 = vpop.f32.mrf.mxu1 }
 0x374   : > { %v3143_v11 = vpop.f32.mrf.mxu2  ;;  %v3106_v52 = vadd.f32 %v3105_v7, %v3063_v60 }
 0x376   : > { %v3144_v10 = vadd.f32 %v3143_v11, %v3106_v52 }
 0x378   : > { %v3185_v35 = vadd.f32 %v3184_v1, %v3144_v10 }
 0x37a   : > { %v3190_v13 = vpop.f32.mrf.mxu3 }
 0x37b   : > { %v3109_v14 = vpop.f32.mrf.mxu1  ;;  %v3214_v25 = vpop.f32.mrf.mxu0 }
 0x37c   : > { %v3148_v58 = vpop.f32.mrf.mxu2  ;;  %v3215_v2 = vadd.f32 %v3214_v25, %v3173_v32  ;;  %v3110_v47 = vadd.f32 %v3109_v14, %v3071_v5  ;;  %v2363_v25 = vld [vmem:[#allocation7 + $0x8] sm:$0xff] }
 0x37e   : > { %v3149_v49 = vadd.f32 %v3148_v58, %v3110_v47 }
 0x380   : > { %v3191_v51 = vadd.f32 %v3190_v13, %v3149_v49  ;;  %v3520_v13 = vsel %vm992_vm1, %v2363_v25, 0 }
 0x381   : > { %v5265_v61 = vand.u32 4294901760, %v3520_v13 }
 0x382   : > { %v3348_v16 = vpop.f32.mrf.mxu3 }
 0x383   : > { %v3218_v6 = vpop.f32.mrf.mxu0  ;;  %v3248_v27 = vpop.f32.mrf.mxu1  ;;  %v3543_v32 = vsub.f32 %v3520_v13, %v5265_v61 }
 0x384   : > { %v3298_v28 = vpop.f32.mrf.mxu2  ;;  %v3249_v3 = vadd.f32 %v3248_v27, %v3215_v2  ;;  %v3219_v17 = vadd.f32 %v3218_v6, %v3179_v57 }
 0x386   : > { %v3299_v26 = vadd.f32 %v3298_v28, %v3249_v3 }
 0x388   : > { %v3349_v12 = vadd.f32 %v3348_v16, %v3299_v26  ;;  %v4380_v26 = vld [vmem:[%s5416_s8 + $0x8] sm:$0xff] }
 0x389   : > { %3516 = vperm.xlu0 %4468, %v4380_v26  }
 0x38a   : > { %v3352_v4 = vpop.f32.mrf.mxu3 }
 0x38b   : > { %v3222_v37 = vpop.f32.mrf.mxu0  ;;  %v3252_v54 = vpop.f32.mrf.mxu1 }
 0x38c   : > { %v3306_v9 = vpop.f32.mrf.mxu2  ;;  %v3253_v21 = vadd.f32 %v3252_v54, %v3219_v17  ;;  %v3223_v30 = vadd.f32 %v3222_v37, %v3185_v35 }
 0x38e   : > { %v3307_v53 = vadd.f32 %v3306_v9, %v3253_v21 }
 0x390   : > { %v3353_v15 = vadd.f32 %v3352_v4, %v3307_v53 }
 0x392   : > { %v3356_v46 = vpop.f32.mrf.mxu3 }
 0x393   : > { %v3226_v20 = vpop.f32.mrf.mxu0  ;;  %v3256_v0 = vpop.f32.mrf.mxu1 }
 0x394   : > { %v3314_v48 = vpop.f32.mrf.mxu2  ;;  %v3257_v24 = vadd.f32 %v3256_v0, %v3223_v30  ;;  %v3227_v1 = vadd.f32 %v3226_v20, %v3191_v51  ;;  %v5269_v20 = vand.u32 4294901760, %v5200_v41  ;;  %v4036_v51 = vand.u32 4294901760, %v5211_v50 }
 0x396   : > { %v3315_v42 = vadd.f32 %v3314_v48, %v3257_v24 }
 0x398   : > { %v3357_v7 = vadd.f32 %v3356_v46, %v3315_v42 }
 0x39a   : > { %v3360_v43 = vpop.f32.mrf.mxu3 }
 0x39b   : > { %v3260_v59 = vpop.f32.mrf.mxu1  ;;  %v3384_v44 = vpop.f32.mrf.mxu0 }
 0x39c   : > { %v3322_v40 = vpop.f32.mrf.mxu2  ;;  %v3385_v22 = vadd.f32 %v3384_v44, %v3349_v12  ;;  %v3261_v11 = vadd.f32 %v3260_v59, %v3227_v1  ;;  %v5279_v59 = vsub.f32 %v5200_v41, %v5269_v20  ;;  %v3544_v44 = vand.u32 4294901760, %v3543_v32 }
 0x39e   : > { %v3323_v27 = vadd.f32 %v3322_v40, %v3261_v11  ;;  %v3772_v41 = vand.u32 4294901760, %v5279_v59  ;;  %v3545_v21 = vsub.f32 %v3543_v32, %v3544_v44 }
 0x3a0   : > { %v3361_v9 = vadd.f32 %v3360_v43, %v3323_v27  ;;  %v4371_v43 = vld [vmem:[%s5411_s3 + $0x8] sm:$0xff]  ;;  %v3546_v53 = vand.u32 4294901760, %v3545_v21 }
 0x3a1   : > { %v3727_v40 = vsel %vm533_vm0, %v4371_v43, 0 }
 0x3a2   : > { %v3499_v23 = vpop.f32.mrf.mxu3 }
 0x3a3   : > { %v3389_v33 = vpop.f32.mrf.mxu0  ;;  %v3423_v34 = vpop.f32.mrf.mxu1 }
 0x3a4   : > { %v3424_v56 = vadd.f32 %v3423_v34, %v3385_v22  ;;  %v3465_v45 = vpop.f32.mrf.mxu2  ;;  %v3390_v18 = vadd.f32 %v3389_v33, %v3353_v15  ;;  %v5298_v33 = vand.u32 4294901760, %v3727_v40 }
 0x3a6   : > { %v3466_v62 = vadd.f32 %v3465_v45, %v3424_v56  ;;  %v3773_v56 = vsub.f32 %v5279_v59, %v3772_v41 }
 0x3a8   : > { %v3500_v19 = vadd.f32 %v3499_v23, %v3466_v62  ;;  %v5306_v62 = vsub.f32 %v3727_v40, %v5298_v33 }
 0x3aa   : > { %4382 = vst [vmem:[%s5046_s21 + $0x20] sm:$0xff] %v3500_v19  ;;  %v3503_v36 = vpop.f32.mrf.mxu3  ;;  %v5287_v17 = vand.u32 4294901760, %v3500_v19 }
 0x3ab   : > { %v3429_v38 = vpop.f32.mrf.mxu1  ;;  %v3394_v31 = vpop.f32.mrf.mxu0 }
 0x3ac   : > { %v3430_v60 = vadd.f32 %v3429_v38, %v3390_v18  ;;  %v3469_v29 = vpop.f32.mrf.mxu2  ;;  %v3395_v58 = vadd.f32 %v3394_v31, %v3357_v7  ;;  %v3582_v35 = vsub.f32 %v3500_v19, %v5287_v17  ;;  %v3774_v19 = vand.u32 4294901760, %v3773_v56 }
 0x3ad   : > { %v3890_v38 = vand.u32 4294901760, %v5197_v63 }
 0x3ae   : > { %v3470_v5 = vadd.f32 %v3469_v29, %v3430_v60  ;;  %v3583_v24 = vand.u32 4294901760, %v3582_v35 }
 0x3af   : > { %v3917_v1 = vsub.f32 %v5197_v63, %v3890_v38 }
 0x3b0   : > { %v3504_v14 = vadd.f32 %v3503_v36, %v3470_v5  ;;  %v5312_v36 = vand.u32 4294901760, %v5306_v62  ;;  %v3584_v60 = vsub.f32 %v3582_v35, %v3583_v24  ;;  %v4063_v5 = vsub.f32 %v5211_v50, %v4036_v51 }
 0x3b2   : > { %4383 = vst [vmem:[%s5046_s21 + $0x28] sm:$0xff] %v3504_v14  ;;  %v3507_v6 = vpop.f32.mrf.mxu3  ;;  %v5281_v57 = vand.u32 4294901760, %v3504_v14  ;;  %v3749_v31 = vsub.f32 %v5306_v62, %v5312_v36  ;;  %v3585_v7 = vand.u32 4294901760, %v3584_v60  ;;  %v4064_v25 = vand.u32 4294901760, %v4063_v5 }
 0x3b3   : > { %v3435_v16 = vpop.f32.mrf.mxu1  ;;  %v3399_v54 = vpop.f32.mrf.mxu0 }
 0x3b4   : > { %v3436_v28 = vadd.f32 %v3435_v16, %v3395_v58  ;;  %v3473_v4 = vpop.f32.mrf.mxu2  ;;  %v3400_v46 = vadd.f32 %v3399_v54, %v3361_v9  ;;  %v3576_v23 = vsub.f32 %v3504_v14, %v5281_v57  ;;  %v3750_v11 = vand.u32 4294901760, %v3749_v31 }
 0x3b5   : > { %v3918_v14 = vand.u32 4294901760, %v3917_v1  ;;  %v4065_v50 = vsub.f32 %v4063_v5, %v4064_v25 }
 0x3b6   : > { %v3474_v37 = vadd.f32 %v3473_v4, %v3436_v28  ;;  %v3577_v30 = vand.u32 4294901760, %v3576_v23 }
 0x3b7   : > { %v3919_v63 = vsub.f32 %v3917_v1, %v3918_v14  ;;  %v4066_v16 = vand.u32 4294901760, %v4065_v50 }
 0x3b8   : > { %v3508_v8 = vadd.f32 %v3507_v6, %v3474_v37  ;;  %v3578_v18 = vsub.f32 %v3576_v23, %v3577_v30 }
 0x3b9   : > { %v3920_v58 = vand.u32 4294901760, %v3919_v63 }
 0x3ba   : > { %4384 = vst [vmem:[%s5046_s21 + $0x30] sm:$0xff] %v3508_v8  ;;  %v3511_v2 = vpop.f32.mrf.mxu3  ;;  %v5272_v55 = vand.u32 4294901760, %v3508_v8  ;;  %v3579_v29 = vand.u32 4294901760, %v3578_v18 }
 0x3bb   : > { %v3441_v0 = vpop.f32.mrf.mxu1 }
 0x3bc   : > { %v3442_v39 = vadd.f32 %v3441_v0, %v3400_v46  ;;  %v3477_v48 = vpop.f32.mrf.mxu2  ;;  %v3570_v12 = vsub.f32 %v3508_v8, %v5272_v55 }
 0x3be   : > { %v3478_v3 = vadd.f32 %v3477_v48, %v3442_v39  ;;  %v3571_v47 = vand.u32 4294901760, %v3570_v12 }
 0x3c0   : > { %v3512_v52 = vadd.f32 %v3511_v2, %v3478_v3  ;;  %v3572_v15 = vsub.f32 %v3570_v12, %v3571_v47 }
 0x3c2   : > { %v5289_v10 = vand.u32 4294901760, %v3512_v52  ;;  %4385 = vst [vmem:[%s5046_s21 + $0x38] sm:$0xff] %v3512_v52  ;;  %v3573_v42 = vand.u32 4294901760, %v3572_v15  ;;  %s4561_s21 = scalar_lea.hbm %s5417_s9, 128 }
 0x3c3   : > { %p4563_p7 = scmp.lt.s32.totalorder %s4561_s21, %s4557_s30 }
 0x3c4   : > { %v3564_v22 = vsub.f32 %v3512_v52, %v5289_v10  ;;  %3535 = vmatpush.msra.mxu0 %v5289_v10  ;;  %3635 = vmatpush.msra.mxu3 %v5289_v10 }
 0x3c5   : > { %p4564_p8 = por %p4563_p7, %p4562_p5 }
 0x3c6   : > { %3537 = vmatpush.msra.mxu0 %v5272_v55  ;;  %3606 = vmatpush.msra.mxu2 %v3564_v22  ;;  %v3565_v34 = vand.u32 4294901760, %v3564_v22 }
 0x3c7   : > { %3637 = vmatpush.msra.mxu3 %v5272_v55  ;;  %p4565_p9 = pnand %p4564_p8, %p4560_p4 }
 0x3c8   : > { %3539 = vmatpush.msra.mxu0 %v5281_v57  ;;  %3609 = vmatpush.msra.mxu2 %v3570_v12  ;;  %v3566_v45 = vsub.f32 %v3564_v22, %v3565_v34 }
 0x3c9   : > { %3639 = vmatpush.msra.mxu3 %v5281_v57 }
 0x3ca   : > { %3541 = vmatpush.msra.mxu0 %v5287_v17  ;;  %3612 = vmatpush.msra.mxu2 %v3576_v23  ;;  %v3567_v49 = vand.u32 4294901760, %v3566_v45 }
 0x3cb   : > { %3641 = vmatpush.msra.mxu3 %v5287_v17  ;;  %3547 = vmatmul.f32.vlgmr.msra.gmra.mxu0 %v3546_v53 }
 0x3cc   : > { %3645 = vmatmul.f32.vlgmr.msra.gmra.mxu3 %v3544_v44  ;;  %3664 = vmatpush.msrb.mxu0 %v3565_v34 }
 0x3cd   : > { %3775 = vmatpush.msrb.mxu3 %v3774_v19  ;;  %3568 = vmatpush.msra.mxu1 %v3567_v49 }
 0x3ce   : > { %3615 = vmatpush.msra.mxu2 %v3582_v35  ;;  %3668 = vmatpush.msrb.mxu0 %v3571_v47 }
 0x3cf   : > { %3869 = vmatpush.msra.mxu3 %v5269_v20  ;;  %3618 = vmatmul.f32.vlgmr.msra.gmra.mxu2 %v3543_v32 }
 0x3d0   : > { %3745 = vmatpush.msrb.mxu2 %v5269_v20  ;;  %3574 = vmatpush.msra.mxu1 %v3573_v42 }
 0x3d1   : > { %3672 = vmatpush.msrb.mxu0 %v3577_v30 }
 0x3d2   : > { %3847 = vmatpush.msra.mxu2 %v3772_v41  ;;  %3580 = vmatpush.msra.mxu1 %v3579_v29 }
 0x3d3   : > { %3676 = vmatpush.msrb.mxu0 %v3583_v24 }
 0x3d4   : > { %3586 = vmatpush.msra.mxu1 %v3585_v7  ;;  %3678 = vmatmul.f32.vlgmr.msrb.gmra.mxu0 %v5265_v61 }
 0x3d5   : > { %3798 = vmatpush.msra.mxu0 %v5279_v59  ;;  %3588 = vmatmul.f32.vlgmr.msra.gmra.mxu1 %v5265_v61 }
 0x3d6   : > { %3695 = vmatpush.msrb.mxu1 %v5289_v10  ;;  %3777 = vmatmul.f32.vlgmr.msrb.gmra.mxu3 %v5298_v33 }
 0x3d7   : > { %3891 = vmatpush.msrb.mxu0 %v3890_v38  ;;  %3967 = vmatpush.msrb.mxu3 %v3890_v38 }
 0x3d8   : > { %3697 = vmatpush.msrb.mxu1 %v5272_v55  ;;  %3751 = vmatmul.f32.vlgmr.msrb.gmra.mxu2 %v3750_v11 }
 0x3d9   : > { %3944 = vmatpush.msrb.mxu2 %v3917_v1 }
 0x3da   : > { %3699 = vmatpush.msrb.mxu1 %v5281_v57 }
 0x3dc   : > { %3701 = vmatpush.msrb.mxu1 %v5287_v17  ;;  %3801 = vmatmul.f32.vlgmr.msra.gmra.mxu0 %v5306_v62 }
 0x3dd   : > { %3703 = vmatmul.f32.vlgmr.msrb.gmra.mxu1 %v5265_v61  ;;  %3993 = vmatpush.msra.mxu0 %v3918_v14 }
 0x3de   : > { %3821 = vmatpush.msra.mxu1 %v5269_v20  ;;  %3871 = vmatmul.f32.vlgmr.msra.gmra.mxu3 %v5298_v33 }
 0x3df   : > { %4067 = vmatpush.msra.mxu3 %v4066_v16 }
 0x3e0   : > { %3921 = vmatpush.msrb.mxu1 %v3920_v58  ;;  %3849 = vmatmul.f32.vlgmr.msra.gmra.mxu2 %v5298_v33 }
 0x3e1   : > { %4037 = vmatpush.msra.mxu2 %v4036_v51 }
 0x3e4   : > { %3897 = vmatmul.f32.vlgmr.msrb.gmra.mxu0 %v3750_v11 }
 0x3e5   : > { %3825 = vmatmul.f32.vlgmr.msra.gmra.mxu1 %v5312_v36  ;;  %4090 = vmatpush.msrb.mxu0 %v4063_v5 }
 0x3e6   : > { %3971 = vmatmul.f32.vlgmr.msrb.gmra.mxu3 %v5312_v36  ;;  %4015 = vmatpush.msra.mxu1 %v3890_v38 }
 0x3e7   : > { %4161 = vmatpush.msrb.mxu3 %v4036_v51 }
 0x3e8   : > { %3947 = vmatmul.f32.vlgmr.msrb.gmra.mxu2 %v5306_v62 }
 0x3e9   : > { %4139 = vmatpush.msrb.mxu2 %v4064_v25 }
 0x3ec   : > { %3995 = vmatmul.f32.vlgmr.msra.gmra.mxu0 %v5298_v33 }
 0x3ed   : > { %3923 = vmatmul.f32.vlgmr.msrb.gmra.mxu1 %v5298_v33 }
 0x3ee   : > { %4069 = vmatmul.f32.vlgmr.msra.gmra.mxu3 %v5298_v33  ;;  %4113 = vmatpush.msrb.mxu1 %v4036_v51 }
 0x3f0   : > { %4043 = vmatmul.f32.vlgmr.msra.gmra.mxu2 %v3750_v11 }
 0x3f4   : > { %4093 = vmatmul.f32.vlgmr.msrb.gmra.mxu0 %v5306_v62 }
 0x3f5   : > { %4017 = vmatmul.f32.vlgmr.msra.gmra.mxu1 %v5298_v33 }
 0x3f6   : > { %4163 = vmatmul.f32.vlgmr.msrb.gmra.mxu3 %v5298_v33 }
 0x3f8   : > { %4141 = vmatmul.f32.vlgmr.msrb.gmra.mxu2 %v5298_v33 }
 0x3fd   : > { %4117 = vmatmul.f32.vlgmr.msrb.gmra.mxu1 %v5312_v36 }
 0x3fe   : > { %4568 = shalt.err (!%p4565_p9)
}
 0x3ff   : > { %s4650_s22 = smov 128   ;;  %s4651_s11 = smov 256   ;;  %v3517_v27 = vpop.permute.xlu0 %3516 }
 0x400   : > { %s4652_s20 = smov 8   ;;  %s4185_s28 = scalar_lea.sflag [#allocation11], %s4796_s23 }
 0x401   : > { %4405 = dma.vmem_to_hbm [thread:$0]  (%p4751_p6), %s4197_s29, 1024, %s4199_s4, %s4180_s27, %s4650_s22, %s4651_s11, %s4652_s20  }
 0x402   : > { %s4211_s29 = scalar_lea.hbm %s5418_s10, %s4390_s26  ;;  %s4212_s4 = sshll.u32 %s5189_s19, 4  ;;  %s4213_s4 = int_to_ptr.vmem [resolvable:$true] %s4212_s4 }
 0x403   : > { %s4214_s27 = sshll.u32 %s4211_s29, 4  ;;  %s4589_s18 = scalar_lea.hbm %s5418_s10, 96  ;;  %s4215_s27 = int_to_ptr.hbm [resolvable:$true] %s4214_s27 }
 0x404   : > { %s4583_s30 = sshra.s32 %s4215_s27, 4  ;;  %s4584_s30 = int_to_ptr.hbm [resolvable:$true] %s4583_s30 }
 0x405   : > { %s4585_s12 = scalar_lea.hbm %s4584_s30, 48  ;;  %p4590_p0 = scmp.lt.s32.totalorder %s4584_s30, %s5418_s10 }
 0x406   : > { %p4586_p11 = scmp.ne.s32.totalorder %s4584_s30, %s4585_s12  ;;  %p4591_p2 = scmp.lt.s32.totalorder %s4589_s18, %s4585_s12 }
 0x408   : > { %p4587_p12 = pnand %p4586_p11, %p4751_p6  ;;  %p4592_p3 = por %p4591_p2, %p4590_p0 }
 0x40a   : > { %p4588_p13 = pneg %p4587_p12 }
 0x40c   : > { %p4593_p4 = pnand %p4592_p3, %p4588_p13 }
 0x448   : > { %v3548_v6 = vpop.f32.mrf.mxu0 }
 0x449   : > { %v3549_v28 = vadd.f32 %v3548_v6, %v3517_v27 }
 0x44f   : > { %v3646_v4 = vpop.f32.mrf.mxu3 }
 0x451   : > { %v3679_v61 = vpop.f32.mrf.mxu0 }
 0x452   : > { %v3589_v13 = vpop.f32.mrf.mxu1  ;;  %v3619_v37 = vpop.f32.mrf.mxu2 }
 0x453   : > { %v3590_v54 = vadd.f32 %v3589_v13, %v3549_v28 }
 0x455   : > { %v3620_v9 = vadd.f32 %v3619_v37, %v3590_v54 }
 0x457   : > { %v3647_v8 = vadd.f32 %v3646_v4, %v3620_v9 }
 0x459   : > { %v3680_v46 = vadd.f32 %v3679_v61, %v3647_v8  ;;  %v3778_v20 = vpop.f32.mrf.mxu3  ;;  %v3802_v48 = vpop.f32.mrf.mxu0 }
 0x45a   : > { %v3704_v0 = vpop.f32.mrf.mxu1 }
 0x45b   : > { %v3752_v32 = vpop.f32.mrf.mxu2  ;;  %v3705_v39 = vadd.f32 %v3704_v0, %v3680_v46 }
 0x45c   : > { %v3779_v52 = vadd.f32 %v3778_v20, %v3752_v32 }
 0x45d   : > { %v4381_v2 = vmul.f32 -1.442695, %v3705_v39 }
 0x45e   : > { %v3803_v12 = vadd.f32 %v3802_v48, %v3779_v52 }
 0x45f   : > { %4477 = vpow2.f32 %v4381_v2 }
 0x461   : > { %v3872_v55 = vpop.f32.mrf.mxu3  ;;  %v3898_v59 = vpop.f32.mrf.mxu0 }
 0x462   : > { %v3826_v3 = vpop.f32.mrf.mxu1 }
 0x463   : > { %v3850_v43 = vpop.f32.mrf.mxu2  ;;  %v3827_v23 = vadd.f32 %v3826_v3, %v3803_v12 }
 0x465   : > { %v4478_v44 = vpop.eup %4477  ;;  %v3851_v53 = vadd.f32 %v3850_v43, %v3827_v23 }
 0x466   : > { %v3710_v57 = vadd.f32 1.0, %v4478_v44 }
 0x467   : > { %v3873_v51 = vadd.f32 %v3872_v55, %v3851_v53 }
 0x468   : > { %4479 = vrcp.f32 %v3710_v57  ;;  %v3722_v56 = vand.u32 2147483648, %v3710_v57  ;;  %v3720_v49 = vand.u32 2147483647, %v3710_v57  ;;  %vm3716_vm11 = vweird.f32 %v3710_v57 }
 0x469   : > { %v3972_v26 = vpop.f32.mrf.mxu3  ;;  %v3996_v41 = vpop.f32.mrf.mxu0 }
 0x46a   : > { %v3924_v40 = vpop.f32.mrf.mxu1  ;;  %v3723_v18 = vor.u32 1.1754944e-38, %v3722_v56  ;;  %vm3721_vm13 = vcmp.eq.f32.partialorder %v3720_v49, 8.507059e+37 }
 0x46b   : > { %v3948_v17 = vpop.f32.mrf.mxu2  ;;  %v3925_v10 = vadd.f32 %v3924_v40, %v3898_v59 }
 0x46d   : > { %v3949_v21 = vadd.f32 %v3948_v17, %v3925_v10 }
 0x46e   : > { %v4480_v22 = vpop.eup %4479 }
 0x46f   : > { %v3712_v33 = vmul.f32 %v4480_v22, %v3710_v57  ;;  %v3973_v34 = vadd.f32 %v3972_v26, %v3949_v21  ;;  %vm3717_vm10 = vweird.f32 %v4480_v22 }
 0x470   : > { %vm3718_vm12 = vmor %vm3716_vm11, %vm3717_vm10 }
 0x471   : > { %v3713_v35 = vsub.f32 1.0, %v3712_v33  ;;  %v4070_v47 = vpop.f32.mrf.mxu3  ;;  %v3997_v15 = vadd.f32 %v3996_v41, %v3973_v34  ;;  %v4094_v36 = vpop.f32.mrf.mxu0 }
 0x472   : > { %v4018_v45 = vpop.f32.mrf.mxu1 }
 0x473   : > { %v4044_v30 = vpop.f32.mrf.mxu2  ;;  %v3714_v62 = vmul.f32 %v4480_v22, %v3713_v35  ;;  %v4019_v42 = vadd.f32 %v4018_v45, %v3997_v15 }
 0x474   : > { %v4071_v19 = vadd.f32 %v4070_v47, %v4044_v30 }
 0x475   : > { %v3715_v24 = vadd.f32 %v4480_v22, %v3714_v62 }
 0x476   : > { %v4095_v1 = vadd.f32 %v4094_v36, %v4071_v19 }
 0x477   : > { %v3719_v38 = vsel %vm3718_vm12, %v4480_v22, %v3715_v24 }
 0x478   : > { %v3724_v60 = vsel %vm3721_vm13, %v3723_v18, %v3719_v38 }
 0x479   : > { %v4167_v29 = vmul.f32 %v3873_v51, %v3724_v60  ;;  %v4168_v31 = vmul.f32 %v4019_v42, %v3724_v60  ;;  %v4164_v14 = vpop.f32.mrf.mxu3 }
 0x47a   : > { %v4118_v5 = vpop.f32.mrf.mxu1 }
 0x47b   : > { %v4142_v7 = vpop.f32.mrf.mxu2  ;;  %4386 = vst [vmem:[%s5189_s19 + $0x18] sm:$0xff] %v4167_v29  ;;  %v4119_v11 = vadd.f32 %v4118_v5, %v4095_v1 }
 0x47c   : > { %4387 = vst [vmem:[%s5189_s19 + $0x20] sm:$0xff] %v4168_v31 }
 0x47d   : > { %v4143_v25 = vadd.f32 %v4142_v7, %v4119_v11 }
 0x47f   : > { %v4165_v63 = vadd.f32 %v4164_v14, %v4143_v25 }
 0x481   : > { %v4169_v50 = vmul.f32 %v4165_v63, %v3724_v60 }
 0x483   : > { %4388 = vst [vmem:[%s5189_s19 + $0x28] sm:$0xff] %v4169_v50 }
 0x484   : > { %4596 = shalt.err (!%p4593_p4)
}
 0x485   : > { %4406 = dma.vmem_to_hbm [thread:$0]  (%p4751_p6), %s4213_s4, 768, %s4215_s27, %s4185_s28, %s4650_s22, %s4651_s11, %s4652_s20  }
 0x486 PF: > { %s4229_s23 = sand.u32 1, %s4631_s13   ;;  %p4417_p5 = pnand %p4360_p1, %p4757_p10 }
 0x487   : > { %s4230_s19 = scalar_lea.sflag [#allocation6], %s4229_s23 }
 0x488   : > { %p4418_p7 = pneg %p4417_p5 }
 0x48a   : > { %4622 = dma.done.wait (%p4418_p7), %s4230_s19, 1024  }
 0x48b   : > { %4624 = vsyncadd (%p4418_p7), %s4230_s19, 4294966272  ;;  %s4240_s1 = scalar_lea.sflag [#allocation11], %s4229_s23 }
 0x48c   : > { %4626 = dma.done.wait (%p4418_p7), %s4240_s1, 768  }
 0x48d   : > { %4628 = vsyncadd (%p4418_p7), %s4240_s1, 4294966528  ;;  %s5471_s16 = sld [smem:[#allocation16_spill]]  ;;  %s5473_s13 = smov %s4635_s14 }
 0x48e   : > { %s5472_s24 = sld [smem:[#allocation17_spill]]  ;;  %s5474_s14 = smov %s4639_s15 }
 0x493   : > { %p26_p6 = scmp.ge.s32.totalorder %s5471_s16, 4  }
 0x494   : > { %s5475_s15 = smov %s5472_s24 }
 0x495   :  { %28 = sbr.rel (!%p26_p6) target bundleno = 11 (0xb), region = 215 }
 0x49a   :  { %4246 = vsyncpa [#allocation5], 1 }
 0x49b   :  { %4248 = vsyncpa [#allocation5 + $0x1], 1 }
 0x49c   :  { %4249 = vsyncpa [#allocation8], 1 }
 0x49d   :  { %4250 = vsyncpa [#allocation6], 1 }
 0x49e   :  { %4252 = vsyncpa [#allocation6 + $0x1], 1 }
 0x49f   :  { %4253 = vsyncpa [#allocation11], 1 }
 0x4a0   :  { %4255 = vsyncpa [#allocation11 + $0x1], 1 }

</bundles_post_ra>
